<compile_context>
chip_gen: v7x
topology: tpu7x:2x2x1
jax: 0.10.0
libtpu: 0.0.40
codegen_flags: <defaults>
</compile_context>

<pallas_src>
import jax
import jax.numpy as jnp
from jax.experimental import pallas as pl
from jax.experimental.pallas import tpu as pltpu

D_HALF = 512            # each embedding's feature dim
D_IN, D1, D2, D3 = 1024, 512, 256, 128
D_OUT = 14
D_OUT_PAD = 128         # lane-dense padded logits width
TB_DEFAULT = 1024       # max batch-tile rows per grid step


def _round_up(x, m):
    return ((x + m - 1) // m) * m


def _choose_tiling(batch, tb_max):
    """Pick (TB, B_pad, n_steps): pad B only to a multiple of 16, keep >=2 grid
    steps when B >= 32 (v7x megacore), and never over-pad to a full TB."""
    b16 = _round_up(max(batch, 16), 16)
    n_steps = max(1, pl.cdiv(b16, tb_max))
    if b16 >= 32:
        n_steps = max(n_steps, 2)          # shard across both v7x TensorCores
    tb = _round_up(pl.cdiv(b16, n_steps), 16)
    b_pad = n_steps * tb                   # waste <= 16*n_steps rows
    return tb, b_pad, n_steps


def _fusion_mlp_kernel(t_ref, i_ref,
                       w1a_ref, w1b_ref, b1_ref,
                       w2_ref, b2_ref,
                       w3_ref, b3_ref,
                       w4_ref, b4_ref,
                       o_ref):
    t = t_ref[...]      # (TB, 512) bf16
    im = i_ref[...]     # (TB, 512) bf16

    # fc1 (concat fused as two partial matmuls) + relu
    h = (jnp.dot(t, w1a_ref[...], preferred_element_type=jnp.float32)
         + jnp.dot(im, w1b_ref[...], preferred_element_type=jnp.float32)
         + b1_ref[...])
    h = jnp.maximum(h, 0.0).astype(jnp.bfloat16)

    # fc2 + relu
    h = jnp.dot(h, w2_ref[...], preferred_element_type=jnp.float32) + b2_ref[...]
    h = jnp.maximum(h, 0.0).astype(jnp.bfloat16)

    # dropout(p=0.3): identity at inference (PyTorch eval mode).
    # TODO(synk): training-mode dropout (pltpu.prng_random_bits mask) not emitted.

    # fc3 + relu
    h = jnp.dot(h, w3_ref[...], preferred_element_type=jnp.float32) + b3_ref[...]
    h = jnp.maximum(h, 0.0).astype(jnp.bfloat16)

    # fc4 logits (padded to 128 lanes; extra columns are zero weights/bias)
    out = jnp.dot(h, w4_ref[...], preferred_element_type=jnp.float32) + b4_ref[...]
    o_ref[...] = out.astype(o_ref.dtype)   # bf16 writeback (halved output traffic)


def prepare_fusion_params(params):
    """One-time weight preparation. Call ONCE and cache the result; do not
    re-run per forward call (it would re-emit ~8 small XLA ops per call)."""
    w1, b1, w2, b2, w3, b3, w4, b4 = params
    w1a = w1[:D_HALF].astype(jnp.bfloat16)          # (512, 512)
    w1b = w1[D_HALF:].astype(jnp.bfloat16)          # (512, 512)
    w2b = w2.astype(jnp.bfloat16)                   # (512, 256)
    w3b = w3.astype(jnp.bfloat16)                   # (256, 128)
    w4p = jnp.zeros((D3, D_OUT_PAD), jnp.bfloat16).at[:, :D_OUT].set(
        w4.astype(jnp.bfloat16))                    # (128, 128) zero-padded
    b4p = jnp.zeros((1, D_OUT_PAD), jnp.float32).at[0, :D_OUT].set(b4)
    b1r = b1.reshape(1, D1).astype(jnp.float32)
    b2r = b2.reshape(1, D2).astype(jnp.float32)
    b3r = b3.reshape(1, D3).astype(jnp.float32)
    return (w1a, w1b, b1r, w2b, b2r, w3b, b3r, w4p, b4p)


def fusion_model_forward(text_embedding, image_embedding, prepared_params,
                         *, tb=TB_DEFAULT):
    """text_embedding: (B, 512), image_embedding: (B, 512) -> (B, 14) f32 logits.

    `prepared_params` must come from prepare_fusion_params (called once).
    Pass bf16 embeddings from the producer when possible to skip the cast."""
    B = text_embedding.shape[0]
    (w1a, w1b, b1r, w2b, b2r, w3b, b3r, w4p, b4p) = prepared_params

    TB, B_pad, n_steps = _choose_tiling(B, tb)

    t = (text_embedding if text_embedding.dtype == jnp.bfloat16
         else text_embedding.astype(jnp.bfloat16))
    im = (image_embedding if image_embedding.dtype == jnp.bfloat16
          else image_embedding.astype(jnp.bfloat16))
    if B_pad != B:
        t = jnp.pad(t, ((0, B_pad - B), (0, 0)))
        im = jnp.pad(im, ((0, B_pad - B), (0, 0)))

    act_spec = pl.BlockSpec((TB, D_HALF), lambda i: (i, 0))
    const = lambda shape: pl.BlockSpec(shape, lambda i: (0, 0))

    out = pl.pallas_call(
        _fusion_mlp_kernel,
        out_shape=jax.ShapeDtypeStruct((B_pad, D_OUT_PAD), jnp.bfloat16),
        grid=(n_steps,),
        in_specs=[
            act_spec, act_spec,
            const((D_HALF, D1)), const((D_HALF, D1)), const((1, D1)),
            const((D1, D2)), const((1, D2)),
            const((D2, D3)), const((1, D3)),
            const((D3, D_OUT_PAD)), const((1, D_OUT_PAD)),
        ],
        out_specs=pl.BlockSpec((TB, D_OUT_PAD), lambda i: (i, 0)),
        compiler_params=pltpu.CompilerParams(
            dimension_semantics=("parallel",),
            vmem_limit_bytes=32 << 20,
        ),
    )(t, im, w1a, w1b, b1r, w2b, b2r, w3b, b3r, w4p, b4p)

    return out[:B, :D_OUT].astype(jnp.float32)


def init_params(key):
    """Deterministic init matching nn.Linear shapes (stored transposed: [in, out])."""
    ks = jax.random.split(key, 8)

    def linear(kw, kb, fan_in, fan_out):
        bound = 1.0 / jnp.sqrt(fan_in)
        w = jax.random.uniform(kw, (fan_in, fan_out), jnp.float32, -bound, bound)
        b = jax.random.uniform(kb, (fan_out,), jnp.float32, -bound, bound)
        return w, b

    w1, b1 = linear(ks[0], ks[1], D_IN, D1)
    w2, b2 = linear(ks[2], ks[3], D1, D2)
    w3, b3 = linear(ks[4], ks[5], D2, D3)
    w4, b4 = linear(ks[6], ks[7], D3, D_OUT)
    return (w1, b1, w2, b2, w3, b3, w4, b4)


def reference_forward(text_embedding, image_embedding, params):
    """Reference matching the kernel's numerics: bf16 operands, f32 accumulate,
    bf16 logits writeback upcast to f32."""
    w1, b1, w2, b2, w3, b3, w4, b4 = params

    def lin(x, w, b):
        return jnp.dot(x.astype(jnp.bfloat16), w.astype(jnp.bfloat16),
                       preferred_element_type=jnp.float32) + b

    x = jnp.concatenate([text_embedding, image_embedding], axis=1)
    x = jnp.maximum(lin(x, w1, b1), 0.0).astype(jnp.bfloat16)
    x = jnp.maximum(lin(x, w2, b2), 0.0).astype(jnp.bfloat16)
    x = jnp.maximum(lin(x, w3, b3), 0.0).astype(jnp.bfloat16)
    logits = lin(x, w4, b4)
    return logits.astype(jnp.bfloat16).astype(jnp.float32)


if __name__ == "__main__":
    key = jax.random.PRNGKey(0)
    k_params, k_text, k_img = jax.random.split(key, 3)

    B = 20  # small, non-multiple-of-16 batch to exercise padding + slicing
    params = init_params(k_params)
    prepared = prepare_fusion_params(params)   # one-time weight prep (cached)

    text_emb = jax.random.normal(k_text, (B, D_HALF), jnp.float32)
    image_emb = jax.random.normal(k_img, (B, D_HALF), jnp.float32)

    out = fusion_model_forward(text_emb, image_emb, prepared)
    out = jax.block_until_ready(out)

    ref = reference_forward(text_emb, image_emb, params)
    assert out.shape == (B, D_OUT), out.shape
    assert jnp.allclose(out, ref, atol=2e-2, rtol=2e-2), "mismatch vs reference"

    print("KERNEL_OK")
</pallas_src>

<mosaic_0001>
module attributes {stable_mosaic.version = 11 : i64} {
  func.func @_fusion_mlp_kernel(%arg0: i32, %arg1: memref<16x512xbf16, #tpu.memory_space<vmem>>, %arg2: memref<16x512xbf16, #tpu.memory_space<vmem>>, %arg3: memref<512x512xbf16, #tpu.memory_space<vmem>>, %arg4: memref<512x512xbf16, #tpu.memory_space<vmem>>, %arg5: memref<1x512xf32, #tpu.memory_space<vmem>>, %arg6: memref<512x256xbf16, #tpu.memory_space<vmem>>, %arg7: memref<1x256xf32, #tpu.memory_space<vmem>>, %arg8: memref<256x128xbf16, #tpu.memory_space<vmem>>, %arg9: memref<1x128xf32, #tpu.memory_space<vmem>>, %arg10: memref<128x128xbf16, #tpu.memory_space<vmem>>, %arg11: memref<1x128xf32, #tpu.memory_space<vmem>>, %arg12: memref<16x128xbf16, #tpu.memory_space<vmem>>) attributes {dimension_semantics = [#tpu.dimension_semantics<parallel>], iteration_bounds = array<i64: 2>, scalar_prefetch = 0 : i64, scratch_operands = 0 : i64, tpu.core_type = #tpu.core_type<tc>, window_params = [{transform_indices = @transform_0, window_bounds = array<i64: 16, 512>}, {transform_indices = @transform_1, window_bounds = array<i64: 16, 512>}, {pipeline_mode = #tpu.pipeline_mode<synchronous>, transform_indices = @transform_2, window_bounds = array<i64: 512, 512>}, {pipeline_mode = #tpu.pipeline_mode<synchronous>, transform_indices = @transform_3, window_bounds = array<i64: 512, 512>}, {pipeline_mode = #tpu.pipeline_mode<synchronous>, transform_indices = @transform_4, window_bounds = array<i64: 1, 512>}, {pipeline_mode = #tpu.pipeline_mode<synchronous>, transform_indices = @transform_5, window_bounds = array<i64: 512, 256>}, {pipeline_mode = #tpu.pipeline_mode<synchronous>, transform_indices = @transform_6, window_bounds = array<i64: 1, 256>}, {pipeline_mode = #tpu.pipeline_mode<synchronous>, transform_indices = @transform_7, window_bounds = array<i64: 256, 128>}, {pipeline_mode = #tpu.pipeline_mode<synchronous>, transform_indices = @transform_8, window_bounds = array<i64: 1, 128>}, {pipeline_mode = #tpu.pipeline_mode<synchronous>, transform_indices = @transform_9, window_bounds = array<i64: 128, 128>}, {pipeline_mode = #tpu.pipeline_mode<synchronous>, transform_indices = @transform_10, window_bounds = array<i64: 1, 128>}, {transform_indices = @transform_11, window_bounds = array<i64: 16, 128>}]} {
    %c0 = arith.constant 0 : index
    %c0_0 = arith.constant 0 : index
    %0 = vector.load %arg1[%c0, %c0_0] : memref<16x512xbf16, #tpu.memory_space<vmem>>, vector<16x512xbf16>
    %c0_1 = arith.constant 0 : index
    %c0_2 = arith.constant 0 : index
    %1 = vector.load %arg2[%c0_1, %c0_2] : memref<16x512xbf16, #tpu.memory_space<vmem>>, vector<16x512xbf16>
    %c0_3 = arith.constant 0 : index
    %c0_4 = arith.constant 0 : index
    %2 = vector.load %arg3[%c0_3, %c0_4] : memref<512x512xbf16, #tpu.memory_space<vmem>>, vector<512x512xbf16>
    %cst = arith.constant dense<0.000000e+00> : vector<16x512xf32>
    %3 = tpu.matmul %0, %2, %cst {dimension_numbers = #tpu.dot_dimension_numbers<[1], [0], [0], [1], [0, 0, 1, 1], [], []>} : vector<16x512xbf16>, vector<512x512xbf16>, vector<16x512xf32> -> vector<16x512xf32>
    %c0_5 = arith.constant 0 : index
    %c0_6 = arith.constant 0 : index
    %4 = vector.load %arg4[%c0_5, %c0_6] : memref<512x512xbf16, #tpu.memory_space<vmem>>, vector<512x512xbf16>
    %cst_7 = arith.constant dense<0.000000e+00> : vector<16x512xf32>
    %5 = tpu.matmul %1, %4, %cst_7 {dimension_numbers = #tpu.dot_dimension_numbers<[1], [0], [0], [1], [0, 0, 1, 1], [], []>} : vector<16x512xbf16>, vector<512x512xbf16>, vector<16x512xf32> -> vector<16x512xf32>
    %6 = arith.addf %3, %5 : vector<16x512xf32>
    %c0_8 = arith.constant 0 : index
    %c0_9 = arith.constant 0 : index
    %7 = vector.load %arg5[%c0_8, %c0_9] : memref<1x512xf32, #tpu.memory_space<vmem>>, vector<1x512xf32>
    %8 = vector.broadcast %7 : vector<1x512xf32> to vector<16x512xf32>
    %9 = arith.addf %6, %8 : vector<16x512xf32>
    %cst_10 = arith.constant 0.000000e+00 : f32
    %10 = vector.broadcast %cst_10 : f32 to vector<16x512xf32>
    %11 = arith.maximumf %9, %10 : vector<16x512xf32>
    %12 = arith.truncf %11 : vector<16x512xf32> to vector<16x512xbf16>
    %c0_11 = arith.constant 0 : index
    %c0_12 = arith.constant 0 : index
    %13 = vector.load %arg6[%c0_11, %c0_12] : memref<512x256xbf16, #tpu.memory_space<vmem>>, vector<512x256xbf16>
    %cst_13 = arith.constant dense<0.000000e+00> : vector<16x256xf32>
    %14 = tpu.matmul %12, %13, %cst_13 {dimension_numbers = #tpu.dot_dimension_numbers<[1], [0], [0], [1], [0, 0, 1, 1], [], []>} : vector<16x512xbf16>, vector<512x256xbf16>, vector<16x256xf32> -> vector<16x256xf32>
    %c0_14 = arith.constant 0 : index
    %c0_15 = arith.constant 0 : index
    %15 = vector.load %arg7[%c0_14, %c0_15] : memref<1x256xf32, #tpu.memory_space<vmem>>, vector<1x256xf32>
    %16 = vector.broadcast %15 : vector<1x256xf32> to vector<16x256xf32>
    %17 = arith.addf %14, %16 : vector<16x256xf32>
    %cst_16 = arith.constant 0.000000e+00 : f32
    %18 = vector.broadcast %cst_16 : f32 to vector<16x256xf32>
    %19 = arith.maximumf %17, %18 : vector<16x256xf32>
    %20 = arith.truncf %19 : vector<16x256xf32> to vector<16x256xbf16>
    %c0_17 = arith.constant 0 : index
    %c0_18 = arith.constant 0 : index
    %21 = vector.load %arg8[%c0_17, %c0_18] : memref<256x128xbf16, #tpu.memory_space<vmem>>, vector<256x128xbf16>
    %cst_19 = arith.constant dense<0.000000e+00> : vector<16x128xf32>
    %22 = tpu.matmul %20, %21, %cst_19 {dimension_numbers = #tpu.dot_dimension_numbers<[1], [0], [0], [1], [0, 0, 1, 1], [], []>} : vector<16x256xbf16>, vector<256x128xbf16>, vector<16x128xf32> -> vector<16x128xf32>
    %c0_20 = arith.constant 0 : index
    %c0_21 = arith.constant 0 : index
    %23 = vector.load %arg9[%c0_20, %c0_21] : memref<1x128xf32, #tpu.memory_space<vmem>>, vector<1x128xf32>
    %24 = vector.broadcast %23 : vector<1x128xf32> to vector<16x128xf32>
    %25 = arith.addf %22, %24 : vector<16x128xf32>
    %cst_22 = arith.constant 0.000000e+00 : f32
    %26 = vector.broadcast %cst_22 : f32 to vector<16x128xf32>
    %27 = arith.maximumf %25, %26 : vector<16x128xf32>
    %28 = arith.truncf %27 : vector<16x128xf32> to vector<16x128xbf16>
    %c0_23 = arith.constant 0 : index
    %c0_24 = arith.constant 0 : index
    %29 = vector.load %arg10[%c0_23, %c0_24] : memref<128x128xbf16, #tpu.memory_space<vmem>>, vector<128x128xbf16>
    %cst_25 = arith.constant dense<0.000000e+00> : vector<16x128xf32>
    %30 = tpu.matmul %28, %29, %cst_25 {dimension_numbers = #tpu.dot_dimension_numbers<[1], [0], [0], [1], [0, 0, 1, 1], [], []>} : vector<16x128xbf16>, vector<128x128xbf16>, vector<16x128xf32> -> vector<16x128xf32>
    %c0_26 = arith.constant 0 : index
    %c0_27 = arith.constant 0 : index
    %31 = vector.load %arg11[%c0_26, %c0_27] : memref<1x128xf32, #tpu.memory_space<vmem>>, vector<1x128xf32>
    %32 = vector.broadcast %31 : vector<1x128xf32> to vector<16x128xf32>
    %33 = arith.addf %30, %32 : vector<16x128xf32>
    %34 = arith.truncf %33 : vector<16x128xf32> to vector<16x128xbf16>
    %c0_28 = arith.constant 0 : index
    %c0_29 = arith.constant 0 : index
    %35 = vector.load %arg12[%c0_28, %c0_29] : memref<16x128xbf16, #tpu.memory_space<vmem>>, vector<16x128xbf16>
    tpu.vector_store %arg12[%c0_28, %c0_29], %34 {strides = array<i32>} : memref<16x128xbf16, #tpu.memory_space<vmem>>, vector<16x128xbf16>,
    return
  }
  func.func @transform_0(%arg0: i32) -> (i32, i32) {
    %c0_i32 = arith.constant 0 : i32
    %c0_i32_0 = arith.constant 0 : i32
    return %arg0, %c0_i32 : i32, i32
  }
  func.func @transform_1(%arg0: i32) -> (i32, i32) {
    %c0_i32 = arith.constant 0 : i32
    %c0_i32_0 = arith.constant 0 : i32
    return %arg0, %c0_i32 : i32, i32
  }
  func.func @transform_2(%arg0: i32) -> (i32, i32) {
    %c0_i32 = arith.constant 0 : i32
    %c0_i32_0 = arith.constant 0 : i32
    %c0_i32_1 = arith.constant 0 : i32
    return %c0_i32, %c0_i32_0 : i32, i32
  }
  func.func @transform_3(%arg0: i32) -> (i32, i32) {
    %c0_i32 = arith.constant 0 : i32
    %c0_i32_0 = arith.constant 0 : i32
    %c0_i32_1 = arith.constant 0 : i32
    return %c0_i32, %c0_i32_0 : i32, i32
  }
  func.func @transform_4(%arg0: i32) -> (i32, i32) {
    %c0_i32 = arith.constant 0 : i32
    %c0_i32_0 = arith.constant 0 : i32
    %c0_i32_1 = arith.constant 0 : i32
    return %c0_i32, %c0_i32_0 : i32, i32
  }
  func.func @transform_5(%arg0: i32) -> (i32, i32) {
    %c0_i32 = arith.constant 0 : i32
    %c0_i32_0 = arith.constant 0 : i32
    %c0_i32_1 = arith.constant 0 : i32
    return %c0_i32, %c0_i32_0 : i32, i32
  }
  func.func @transform_6(%arg0: i32) -> (i32, i32) {
    %c0_i32 = arith.constant 0 : i32
    %c0_i32_0 = arith.constant 0 : i32
    %c0_i32_1 = arith.constant 0 : i32
    return %c0_i32, %c0_i32_0 : i32, i32
  }
  func.func @transform_7(%arg0: i32) -> (i32, i32) {
    %c0_i32 = arith.constant 0 : i32
    %c0_i32_0 = arith.constant 0 : i32
    %c0_i32_1 = arith.constant 0 : i32
    return %c0_i32, %c0_i32_0 : i32, i32
  }
  func.func @transform_8(%arg0: i32) -> (i32, i32) {
    %c0_i32 = arith.constant 0 : i32
    %c0_i32_0 = arith.constant 0 : i32
    %c0_i32_1 = arith.constant 0 : i32
    return %c0_i32, %c0_i32_0 : i32, i32
  }
  func.func @transform_9(%arg0: i32) -> (i32, i32) {
    %c0_i32 = arith.constant 0 : i32
    %c0_i32_0 = arith.constant 0 : i32
    %c0_i32_1 = arith.constant 0 : i32
    return %c0_i32, %c0_i32_0 : i32, i32
  }
  func.func @transform_10(%arg0: i32) -> (i32, i32) {
    %c0_i32 = arith.constant 0 : i32
    %c0_i32_0 = arith.constant 0 : i32
    %c0_i32_1 = arith.constant 0 : i32
    return %c0_i32, %c0_i32_0 : i32, i32
  }
  func.func @transform_11(%arg0: i32) -> (i32, i32) {
    %c0_i32 = arith.constant 0 : i32
    %c0_i32_0 = arith.constant 0 : i32
    return %arg0, %c0_i32 : i32, i32
  }
}

</mosaic_0001>

<bundles_post_ra>
// kernel: tpu_custom_call.1
= control target key start
LH: loop header
LB: loop body
LE: loop exit
PB: predicated region body
PF: predicated region fallthrough
CT: control target
= control target key end

     0   :  { %s5314_s0 = inlined_call_operand.hbm [shape: bf16[32,512], index: 0, kind: input, shape index: {}]   ;;  %s5315_s1 = inlined_call_operand.hbm [shape: bf16[32,512], index: 1, kind: input, shape index: {}]   ;;  %s5316_s2 = inlined_call_operand.hbm [shape: bf16[512,512], index: 2, kind: input, shape index: {}]   ;;  %s5317_s3 = inlined_call_operand.hbm [shape: bf16[512,512], index: 3, kind: input, shape index: {}]   ;;  %s5318_s4 = inlined_call_operand.vmem [shape: f32[1,512], index: 4, kind: input, shape index: {}]   ;;  %s5319_s5 = inlined_call_operand.hbm [shape: bf16[512,256], index: 5, kind: input, shape index: {}]   ;;  %s5320_s6 = inlined_call_operand.vmem [shape: f32[1,256], index: 6, kind: input, shape index: {}]   ;;  %s5321_s7 = inlined_call_operand.hbm [shape: bf16[256,128], index: 7, kind: input, shape index: {}]   ;;  %s5322_s8 = inlined_call_operand.vmem [shape: f32[1,128], index: 8, kind: input, shape index: {}]   ;;  %s5323_s9 = inlined_call_operand.hbm [shape: bf16[128,128], index: 9, kind: input, shape index: {}]   ;;  %s5324_s10 = inlined_call_operand.vmem [shape: f32[1,128], index: 10, kind: input, shape index: {}]   ;;  %s5325_s11 = inlined_call_operand.hbm [shape: bf16[32,128], index: 11, kind: output, shape index: {}]  }
   0x1   :  { %5336 = sst [smem:[#allocation22_spill]] %s5314_s0 }
   0x2   :  { %5337 = sst [smem:[#allocation23_spill]] %s5316_s2 }
   0x3   :  { %5338 = sst [smem:[#allocation24_spill]] %s5317_s3 }
   0x4   :  { %5339 = sst [smem:[#allocation25_spill]] %s5319_s5 }
   0x5   :  { %5340 = sst [smem:[#allocation26_spill]] %s5321_s7 }
   0x6   :  { %5341 = sst [smem:[#allocation27_spill]] %s5322_s8 }
   0x7   :  { %5342 = sst [smem:[#allocation28_spill]] %s5323_s9 }
   0x8   :  { %5343 = sst [smem:[#allocation29_spill]] %s5324_s10 }
   0x9   :  { %5344 = sst [smem:[#allocation30_spill]] %s5325_s11 }
   0xa   :  { %16 = vsyncpa [#allocation3], 0 }
   0xb   :  { %18 = vsyncpa [#allocation3 + $0x1], 0 }
   0xc   :  { %19 = vsyncpa [#allocation6], 0 }
   0xd   :  { %21 = vsyncpa [#allocation6 + $0x1], 0 }
   0xe   :  { %22 = vsyncpa [#allocation9], 0 }
   0xf   :  { %23 = vsyncpa [#allocation12], 0 }
  0x10   :  { %24 = vsyncpa [#allocation4], 0 }
  0x11   :  { %26 = vsyncpa [#allocation4 + $0x1], 0  ;;  %s4910_s17 = smov 0   ;;  %s4912_s18 = smov 0  }
  0x12   :  { %s4914_s19 = smov 0   ;;  %s4916_s20 = smov 0  }
  0x13 LB: > { %s4832_s21 = smov [#allocation7]   ;;  %s4931_s23 = sadd.s32 4294967295, %s4830_s20   ;;  %s4830_s20 = sphi %s4916_s20, %s5381_s20   ;;  %s4826_s19 = sphi %s4914_s19, %s5380_s19   ;;  %s4822_s18 = sphi %s4912_s18, %s5379_s18   ;;  %s4818_s17 = sphi %s4910_s17, %s5378_s17  }
  0x14   : > { %s316_s22 = sshll.u32 %s4832_s21, 4  ;;  %p3440_p0 = scmp.ge.s32.totalorder %s4830_s20, 1  ;;  %s4936_s22 = int_to_ptr.vmem [resolvable:$true] %s316_s22 }
  0x15   : > { %p5331_p1 = scmp.eq.s32.totalorder %s4931_s23, 0  ;;  %p304_p2 = scmp.lt.s32.totalorder %s4830_s20, 3 }
  0x16   : > { %s4833_s25 = smov [#allocation8]   ;;  %s4834_s28 = smov [#allocation11]  }
  0x17   : > { %p4938_p3 = pnand %p3440_p0, %p304_p2  ;;  %s329_s26 = sshll.u32 %s4833_s25, 4  ;;  %s4951_s26 = int_to_ptr.vmem [resolvable:$true] %s329_s26 }
  0x18   : > { %s361_s29 = sshll.u32 %s4834_s28, 4  ;;  %s5347_s2 = sld [smem:[#allocation23_spill]]  ;;  %s4953_s29 = int_to_ptr.vmem [resolvable:$true] %s361_s29 }
  0x19   : > { %s5345_s24 = scalar_select %p4938_p3, 1, 0 }
  0x1a   : > { %p3946_p5 = pneg %p4938_p3 }
  0x1c   : > { %p4947_p6 = pnand %p3946_p5, %p5331_p1 }
  0x1e   : > { %s4548_s13 = scalar_lea.hbm %s5347_s2, 16384  ;;  %p4963_p8 = pneg %p4947_p6 }
  0x1f   : > { %p4549_p7 = scmp.ne.s32.totalorder %s5347_s2, %s4548_s13  ;;  %p4555_p11 = scmp.lt.u32.totalorder %s4548_s13, %s5347_s2 }
  0x21   : > { %p4551_p9 = pnand %p4963_p8, %p4549_p7 }
  0x23   : > { %p4552_p10 = pneg %p4551_p9 }
  0x25   : > { %p4557_p12 = pnand %p4555_p11, %p4552_p10 }
  0x27   : > { %4560 = shalt.err (!%p4557_p12)
}
  0x28   : > { %s4561_s28 = scalar_lea.vmem %s4936_s22, 16384  ;;  %p4569_p5 = scmp.lt.s32.totalorder %s4936_s22, %s4936_s22 }
  0x29   : > { %p4562_p13 = scmp.ne.s32.totalorder %s4936_s22, %s4561_s28  ;;  %p4570_p4 = scmp.lt.s32.totalorder %s4561_s28, %s4561_s28 }
  0x2b   : > { %p4564_p0 = pnand %p4562_p13, %p4963_p8  ;;  %p4571_p7 = por %p4570_p4, %p4569_p5 }
  0x2d   : > { %p4565_p2 = pneg %p4564_p0 }
  0x2f   : > { %p4572_p9 = pnand %p4571_p7, %p4565_p2 }
  0x31   : > { %4575 = shalt.err (!%p4572_p9)
}
  0x32   : > { %s5327_s30 = smov 256   ;;  %s5329_s12 = smov 16  }
  0x33   : > { %3949 = dma.hbm_to_vmem [thread:$0]  (!%p4947_p6), %s5347_s2, 16384, %s4936_s22, [#allocation6], %s5327_s30, %s5327_s30, %s5329_s12  }
  0x34   : > { %s5349_s3 = sld [smem:[#allocation24_spill]] }
  0x3a   : > { %s4576_s25 = scalar_lea.hbm %s5349_s3, 16384 }
  0x3b   : > { %p4577_p4 = scmp.ne.s32.totalorder %s5349_s3, %s4576_s25  ;;  %p4583_p12 = scmp.lt.u32.totalorder %s4576_s25, %s5349_s3 }
  0x3d   : > { %p4579_p10 = pnand %p4577_p4, %p4963_p8 }
  0x3f   : > { %p4580_p11 = pneg %p4579_p10 }
  0x41   : > { %p4585_p13 = pnand %p4583_p12, %p4580_p11 }
  0x43   : > { %4588 = shalt.err (!%p4585_p13)
}
  0x44   : > { %s4589_s22 = scalar_lea.vmem %s4951_s26, 16384  ;;  %p4597_p7 = scmp.lt.s32.totalorder %s4951_s26, %s4951_s26 }
  0x45   : > { %p4590_p0 = scmp.ne.s32.totalorder %s4951_s26, %s4589_s22  ;;  %p4598_p9 = scmp.lt.s32.totalorder %s4589_s22, %s4589_s22 }
  0x47   : > { %p4592_p2 = pnand %p4590_p0, %p4963_p8  ;;  %p4599_p4 = por %p4598_p9, %p4597_p7 }
  0x49   : > { %p4593_p5 = pneg %p4592_p2 }
  0x4b   : > { %p4600_p10 = pnand %p4599_p4, %p4593_p5 }
  0x4d   : > { %4603 = shalt.err (!%p4600_p10)
}
  0x4e   : > { %3952 = dma.hbm_to_vmem [thread:$0]  (!%p4947_p6), %s5349_s3, 16384, %s4951_s26, [#allocation9], %s5327_s30, %s5327_s30, %s5329_s12  }
  0x4f   : > { %s5350_s7 = sld [smem:[#allocation26_spill]] }
  0x55   : > { %s4604_s14 = scalar_lea.hbm %s5350_s7, 2048 }
  0x56   : > { %p4605_p11 = scmp.ne.s32.totalorder %s5350_s7, %s4604_s14  ;;  %p4611_p0 = scmp.lt.u32.totalorder %s4604_s14, %s5350_s7 }
  0x58   : > { %p4607_p12 = pnand %p4605_p11, %p4963_p8 }
  0x5a   : > { %p4608_p13 = pneg %p4607_p12 }
  0x5c   : > { %p4613_p2 = pnand %p4611_p0, %p4608_p13 }
  0x5e   : > { %4616 = shalt.err (!%p4613_p2)
}
  0x5f   : > { %s4617_s26 = scalar_lea.vmem %s4953_s29, 2048  ;;  %p4625_p4 = scmp.lt.s32.totalorder %s4953_s29, %s4953_s29 }
  0x60   : > { %p4618_p5 = scmp.ne.s32.totalorder %s4953_s29, %s4617_s26  ;;  %p4626_p10 = scmp.lt.s32.totalorder %s4617_s26, %s4617_s26 }
  0x62   : > { %p4620_p7 = pnand %p4618_p5, %p4963_p8  ;;  %p4627_p11 = por %p4626_p10, %p4625_p4 }
  0x64   : > { %p4621_p9 = pneg %p4620_p7 }
  0x66   : > { %p4628_p12 = pnand %p4627_p11, %p4621_p9 }
  0x68   : > { %4631 = shalt.err (!%p4628_p12)
}
  0x69   : > { %s5333_s22 = smov 64   ;;  %s5334_s8 = smov 4  }
  0x6a   : > { %3958 = dma.hbm_to_vmem [thread:$0]  (!%p4947_p6), %s5350_s7, 2048, %s4953_s29, [#allocation12], %s5333_s22, %s5333_s22, %s5334_s8  }
  0x6b   : > { %s4839_s13 = smov [#allocation10]   ;;  %s5351_s5 = sld [smem:[#allocation25_spill]] }
  0x6c   : > { %s345_s14 = sshll.u32 %s4839_s13, 4  ;;  %s346_s14 = int_to_ptr.vmem [resolvable:$true] %s345_s14 }
  0x71   : > { %s4632_s25 = scalar_lea.hbm %s5351_s5, 8192 }
  0x72   : > { %p4633_p13 = scmp.ne.s32.totalorder %s5351_s5, %s4632_s25  ;;  %p4639_p5 = scmp.lt.u32.totalorder %s4632_s25, %s5351_s5 }
  0x74   : > { %p4635_p0 = pnand %p4633_p13, %p4963_p8 }
  0x76   : > { %p4636_p2 = pneg %p4635_p0 }
  0x78   : > { %p4641_p7 = pnand %p4639_p5, %p4636_p2 }
  0x7a   : > { %4644 = shalt.err (!%p4641_p7)
}
  0x7b   : > { %s4645_s29 = scalar_lea.vmem %s346_s14, 8192  ;;  %p4653_p11 = scmp.lt.s32.totalorder %s346_s14, %s346_s14 }
  0x7c   : > { %p4646_p9 = scmp.ne.s32.totalorder %s346_s14, %s4645_s29  ;;  %p4654_p12 = scmp.lt.s32.totalorder %s4645_s29, %s4645_s29 }
  0x7e   : > { %p4648_p4 = pnand %p4646_p9, %p4963_p8  ;;  %p4655_p1 = por %p4654_p12, %p4653_p11 }
  0x80   : > { %p4649_p10 = pneg %p4648_p4 }
  0x82   : > { %p4656_p3 = pnand %p4655_p1, %p4649_p10 }
  0x84   : > { %4659 = shalt.err (!%p4656_p3)
}
  0x85   : > { %s4840_s10 = smov 128   ;;  %s4841_s11 = smov 8  }
  0x86   : > { %3955 = dma.hbm_to_vmem [thread:$0]  (!%p4947_p6), %s5351_s5, 8192, %s346_s14, [#allocation9], %s4840_s10, %s4840_s10, %s4841_s11  }
  0x87   : > { %s4842_s13 = smov [#allocation13]   ;;  %s5352_s9 = sld [smem:[#allocation28_spill]] }
  0x88   : > { %s377_s15 = sshll.u32 %s4842_s13, 4  ;;  %s378_s15 = int_to_ptr.vmem [resolvable:$true] %s377_s15 }
  0x8d   : > { %s4660_s28 = scalar_lea.hbm %s5352_s9, 1024 }
  0x8e   : > { %p4661_p1 = scmp.ne.s32.totalorder %s5352_s9, %s4660_s28  ;;  %p4667_p0 = scmp.lt.u32.totalorder %s4660_s28, %s5352_s9 }
  0x90   : > { %p4663_p3 = pnand %p4661_p1, %p4963_p8 }
  0x92   : > { %p4664_p13 = pneg %p4663_p3 }
  0x94   : > { %p4669_p2 = pnand %p4667_p0, %p4664_p13 }
  0x96   : > { %4672 = shalt.err (!%p4669_p2)
}
  0x97   : > { %s4673_s14 = scalar_lea.vmem %s378_s15, 1024  ;;  %p4681_p4 = scmp.lt.s32.totalorder %s378_s15, %s378_s15 }
  0x98   : > { %p4674_p5 = scmp.ne.s32.totalorder %s378_s15, %s4673_s14  ;;  %p4682_p10 = scmp.lt.s32.totalorder %s4673_s14, %s4673_s14 }
  0x9a   : > { %p4676_p7 = pnand %p4674_p5, %p4963_p8  ;;  %p4683_p11 = por %p4682_p10, %p4681_p4 }
  0x9c   : > { %p4677_p9 = pneg %p4676_p7 }
  0x9e   : > { %p4684_p12 = pnand %p4683_p11, %p4677_p9 }
  0xa0   : > { %4687 = shalt.err (!%p4684_p12)
}
  0xa1   : > { %s5353_s10 = smov 4   ;;  %s5354_s11 = smov 64  }
  0xa2   : > { %3961 = dma.hbm_to_vmem [thread:$0]  (!%p4947_p6), %s5352_s9, 1024, %s378_s15, [#allocation12], %s5354_s11, %s5354_s11, %s5353_s10  }
  0xa3   : > { %s3439_s27 = sadd.s32 4294967294, %s4830_s20   ;;  %s5080_s16 = sadd.s32 1, %s4830_s20  }
  0xa4   : > { %s39_s30 = sadd.s32 1, %s4826_s19  ;;  %s36_s12 = ssub.s32 %s4830_s20, %s5080_s16 }
  0xa5   : > { %p46_p8 = scmp.ne.s32.totalorder %s4826_s19, %s4822_s18  ;;  %p37_p1 = scmp.eq.s32.totalorder %s36_s12, 0 }
  0xa6   : > { %p47_p3 = scmp.eq.s32.totalorder %s4830_s20, 0  ;;  %p52_p13 = scmp.ne.s32.totalorder %s4822_s18, %s4818_s17 }
  0xa7   : > { %p291_p0 = scmp.eq.s32.totalorder %s4931_s23, 1  ;;  %p5356_p5 = scmp.eq.s32.totalorder %s4931_s23, 0 }
  0xa8   : > { %s5092_s13 = scalar_select %p37_p1, %s4826_s19, %s39_s30  }
  0xa9   : > { %p48_p2 = por %p47_p3, %p46_p8  ;;  %p5096_p7 = por %p5356_p5, %p52_p13 }
  0xaa   : > { %5355 = sst [smem:[#allocation21_spill]] %s5092_s13  ;;  %p5100_p6 = por %p291_p0, %p46_p8 }
  0xab   : > { %p297_p9 = scmp.eq.s32.totalorder %s3439_s27, 1  ;;  %p3978_p4 = scmp.lt.s32.totalorder %s4830_s20, 2 }
  0xac   : > { %s5358_s15 = scalar_select %p5100_p6, 1, 0 }
  0xad   : > { %s394_s25 = sand.u32 1, %s4826_s19   ;;  %p5106_p10 = por %p297_p9, %p52_p13 }
  0xae   : > { %s5110_s26 = sshll.u32 %s394_s25, 5  ;;  %s3826_s29 = sshll.u32 %s4830_s20, 9 }
  0xaf   : > { %s5359_s28 = scalar_select %p5106_p10, 1, 0 }
  0xb0   : > { %s5360_s0 = sld [smem:[#allocation22_spill]]  ;;  %s398_s22 = scalar_lea.vmem [#allocation2], %s5110_s26 }
  0xb1   : > { %s406_s8 = sshll.u32 %s398_s22, 4  ;;  %p5119_p11 = pnand %p3978_p4, %p48_p2  ;;  %s5123_s8 = int_to_ptr.vmem [resolvable:$true] %s406_s8 }
  0xb2   : > { %s5128_s14 = scalar_lea.hbm %s5315_s1, %s3826_s29  ;;  %s5130_s10 = scalar_lea.sflag [#allocation3], %s394_s25 }
  0xb3   : > { %p4690_p8 = pneg %p5119_p11 }
  0xb6   : > { %s5116_s11 = scalar_lea.hbm %s5360_s0, %s3826_s29  ;;  %s4693_s5 = scalar_lea.hbm %s5360_s0, 1024 }
  0xb7   : > { %s4688_s2 = scalar_lea.hbm %s5116_s11, 512  ;;  %p4694_p13 = scmp.lt.u32.totalorder %s5116_s11, %s5360_s0 }
  0xb8   : > { %p4689_p12 = scmp.ne.s32.totalorder %s5116_s11, %s4688_s2  ;;  %p4695_p0 = scmp.lt.u32.totalorder %s4693_s5, %s4688_s2 }
  0xb9   : > { %p4697_p5 = scmp.lt.u32.totalorder %s4688_s2, %s5116_s11 }
  0xba   : > { %p4691_p1 = pnand %p4690_p8, %p4689_p12  ;;  %p4696_p2 = por %p4695_p0, %p4694_p13 }
  0xbc   : > { %p4692_p3 = pneg %p4691_p1  ;;  %p4698_p9 = por %p4697_p5, %p4696_p2 }
  0xbe   : > { %p4699_p4 = pnand %p4698_p9, %p4692_p3 }
  0xc0   : > { %4702 = shalt.err (!%p4699_p4)
}
  0xc1   : > { %s4703_s25 = scalar_lea.vmem %s5123_s8, 512  ;;  %s4843_s3 = smov [#allocation2]  }
  0xc2   : > { %p4704_p12 = scmp.ne.s32.totalorder %s5123_s8, %s4703_s25  ;;  %s4708_s29 = sshll.u32 %s4843_s3, 4  ;;  %s4709_s29 = int_to_ptr.vmem [resolvable:$false] %s4708_s29 }
  0xc3   : > { %s4710_s7 = scalar_lea.vmem %s4709_s29, 1024  ;;  %p4711_p6 = scmp.lt.s32.totalorder %s5123_s8, %s4709_s29 }
  0xc4   : > { %p4706_p1 = pnand %p4704_p12, %p4690_p8  ;;  %p4712_p13 = scmp.lt.s32.totalorder %s4710_s7, %s4703_s25 }
  0xc6   : > { %p4707_p10 = pneg %p4706_p1  ;;  %p4713_p0 = por %p4712_p13, %p4711_p6 }
  0xc8   : > { %p4714_p2 = pnand %p4713_p0, %p4707_p10 }
  0xca   : > { %4717 = shalt.err (!%p4714_p2)
}
  0xcb   : > { %s5362_s2 = smov 16   ;;  %s5363_s5 = smov 256  }
  0xcc   : > { %3965 = dma.hbm_to_vmem [thread:$0]  (!%p5119_p11), %s5116_s11, 512, %s5123_s8, %s5130_s10, %s5363_s5, %s5363_s5, %s5362_s2  }
  0xcd   : > { %s420_s9 = scalar_lea.vmem [#allocation5], %s5110_s26  ;;  %s416_s12 = sand.u32 1, %s4830_s20  }
  0xce   : > { %s428_s30 = sshll.u32 %s420_s9, 4  ;;  %s5165_s22 = scalar_lea.sflag [#allocation6], %s416_s12  ;;  %s5163_s30 = int_to_ptr.vmem [resolvable:$true] %s428_s30 }
  0xcf   : > { %s4718_s25 = scalar_lea.hbm %s5128_s14, 512  ;;  %s4723_s7 = scalar_lea.hbm %s5315_s1, 1024 }
  0xd0   : > { %p4719_p6 = scmp.ne.s32.totalorder %s5128_s14, %s4718_s25  ;;  %p4724_p5 = scmp.lt.u32.totalorder %s5128_s14, %s5315_s1 }
  0xd1   : > { %p4725_p9 = scmp.lt.u32.totalorder %s4723_s7, %s4718_s25  ;;  %p4727_p12 = scmp.lt.u32.totalorder %s4718_s25, %s5128_s14 }
  0xd2   : > { %p4721_p10 = pnand %p4719_p6, %p4690_p8 }
  0xd3   : > { %p4726_p4 = por %p4725_p9, %p4724_p5 }
  0xd4   : > { %p4722_p3 = pneg %p4721_p10 }
  0xd5   : > { %p4728_p1 = por %p4727_p12, %p4726_p4 }
  0xd7   : > { %p4729_p13 = pnand %p4728_p1, %p4722_p3 }
  0xd9   : > { %4732 = shalt.err (!%p4729_p13)
}
  0xda   : > { %s4733_s26 = scalar_lea.vmem %s5163_s30, 512  ;;  %s4844_s11 = smov [#allocation5]  }
  0xdb   : > { %p4734_p0 = scmp.ne.s32.totalorder %s5163_s30, %s4733_s26  ;;  %s4738_s8 = sshll.u32 %s4844_s11, 4  ;;  %s4739_s8 = int_to_ptr.vmem [resolvable:$false] %s4738_s8 }
  0xdc   : > { %s4740_s0 = scalar_lea.vmem %s4739_s8, 1024  ;;  %p4741_p10 = scmp.lt.s32.totalorder %s5163_s30, %s4739_s8 }
  0xdd   : > { %p4736_p2 = pnand %p4734_p0, %p4690_p8  ;;  %p4742_p5 = scmp.lt.s32.totalorder %s4740_s0, %s4733_s26 }
  0xdf   : > { %p4737_p6 = pneg %p4736_p2  ;;  %p4743_p9 = por %p4742_p5, %p4741_p10 }
  0xe1   : > { %p4744_p4 = pnand %p4743_p9, %p4737_p6 }
  0xe3   : > { %4747 = shalt.err (!%p4744_p4)
}
  0xe4   : > { %3968 = dma.hbm_to_vmem [thread:$0]  (!%p5119_p11), %s5128_s14, 512, %s5163_s30, %s5165_s22, %s5363_s5, %s5363_s5, %s5362_s2  }
  0xe5   : > { %p5364_p8 = scmp.ne.s32.totalorder %s5345_s24, 0 }
  0xe6   : > { %s5197_s13 = sand.u32 (!%p5364_p8), 1, %s4822_s18  }
  0xe7   : > { %440 = sbr.rel (%p5364_p8) target bundleno = 1473 (0x5c1), region = 64  ;;  %s3456_s10 = sshll.u32 (!%p5364_p8), %s5197_s13, 5 }
  0xe8   : > { %s443_s9 = scalar_lea.sflag (!%p5364_p8), [#allocation3], %s5197_s13  ;;  %s5201_s12 = scalar_lea.vmem (!%p5364_p8), [#allocation2], %s3456_s10 }
  0xee   : > { %4793 = dma.done.wait (%p5096_p7), %s443_s9, 512  }
  0xef   : > { %4795 = vsyncadd (%p5096_p7), %s443_s9, 4294966784  ;;  %s451_s27 = sand.u32 1, %s4931_s23   ;;  %s5208_s14 = scalar_lea.vmem [#allocation5], %s3456_s10 }
  0xf0   : > { %s452_s24 = scalar_lea.sflag [#allocation6], %s451_s27 }
  0xf1   : > { %4797 = dma.done.wait (%p5096_p7), %s452_s24, 512  }
  0xf2   : > { %4799 = vsyncadd (%p5096_p7), %s452_s24, 4294966784  ;;  %p5365_p11 = scmp.eq.s32.totalorder %s4931_s23, 0 }
  0xf4   : > { %4801 = dma.done.wait (%p5365_p11), [#allocation6], 16384   ;;  %p5366_p3 = pmov %p5365_p11 }
  0xf6   : > { %4803 = vsyncadd (%p5366_p3), [#allocation6], 4294950912  ;;  %p5367_p12 = pmov %p5366_p3 }
  0xf7   : > { %p5368_p1 = pmov %p5366_p3 }
  0xf8   : > { %4805 = dma.done.wait (%p5367_p12), [#allocation9], 24576  }
  0xf9   : > { %4807 = vsyncadd (%p5368_p1), [#allocation9], 4294942720  ;;  %p5369_p13 = pmov %p5368_p1 }
  0xfa   : > { %p5370_p0 = pmov %p5368_p1 }
  0xfb   : > { %4809 = dma.done.wait (%p5369_p13), [#allocation12], 3072  }
  0xfc   : > { %4811 = vsyncadd (%p5370_p0), [#allocation12], 4294964224  ;;  %v4032_v0 = vld [vmem:[#allocation8 + $0x4] ss:$16 sps:$4 sm:$0xff]   ;;  %v4034_v1 = vld [vmem:[#allocation8 + $0xc] ss:$16 sps:$4 sm:$0xff]  }
  0xfd   : > { %1447 = vmatprep.subr.bf16.mxu0 %v4032_v0  ;;  %v4036_v2 = vld [vmem:[#allocation8] ss:$16 sps:$4 sm:$0xff]   ;;  %v4037_v3 = vld [vmem:[#allocation8 + $0x8] ss:$16 sps:$4 sm:$0xff]   ;;  %1533 = vmatprep.subr.bf16.mxu1 %v4034_v1  ;;  %v4038_v4 = vld [vmem:[#allocation8 + $0x24] ss:$16 sps:$4 sm:$0xff]  }
  0xfe   : > { %1448 = vmatpush1.bf16.msra.mxu0 %v4036_v2  ;;  %1534 = vmatpush1.bf16.msra.mxu1 %v4037_v3  ;;  %v4040_v5 = vld [vmem:[#allocation8 + $0x2c] ss:$16 sps:$4 sm:$0xff]   ;;  %v4042_v6 = vld [vmem:[#allocation8 + $0x20] ss:$16 sps:$4 sm:$0xff]   ;;  %v4043_v7 = vld [vmem:[#allocation8 + $0x28] ss:$16 sps:$4 sm:$0xff]  }
  0xff   : > { %1449 = vmatprep.subr.bf16.mxu0 %v4038_v4  ;;  %1535 = vmatprep.subr.bf16.mxu1 %v4040_v5  ;;  %v4044_v8 = vld [vmem:[#allocation8 + $0x44] ss:$16 sps:$4 sm:$0xff]   ;;  %v4046_v9 = vld [vmem:[#allocation8 + $0x4c] ss:$16 sps:$4 sm:$0xff]   ;;  %v4048_v10 = vld [vmem:[#allocation8 + $0x40] ss:$16 sps:$4 sm:$0xff]  }
 0x100   : > { %v4049_v11 = vld [vmem:[#allocation8 + $0x48] ss:$16 sps:$4 sm:$0xff]   ;;  %v4050_v12 = vld [vmem:[#allocation8 + $0x64] ss:$16 sps:$4 sm:$0xff]   ;;  %v4052_v13 = vld [vmem:[#allocation8 + $0x6c] ss:$16 sps:$4 sm:$0xff]  }
 0x101   : > { %v4054_v14 = vld [vmem:[#allocation8 + $0x60] ss:$16 sps:$4 sm:$0xff]   ;;  %v4055_v15 = vld [vmem:[#allocation8 + $0x68] ss:$16 sps:$4 sm:$0xff]   ;;  %v4056_v16 = vld [vmem:[#allocation8 + $0x84] ss:$16 sps:$4 sm:$0xff]  }
 0x102   : > { %1450 = vmatpush1.bf16.msra.mxu0 %v4042_v6  ;;  %1536 = vmatpush1.bf16.msra.mxu1 %v4043_v7  ;;  %v4058_v17 = vld [vmem:[#allocation8 + $0x8c] ss:$16 sps:$4 sm:$0xff]   ;;  %v4060_v18 = vld [vmem:[#allocation8 + $0x80] ss:$16 sps:$4 sm:$0xff]   ;;  %v4061_v19 = vld [vmem:[#allocation8 + $0x88] ss:$16 sps:$4 sm:$0xff]  }
 0x103   : > { %1451 = vmatprep.subr.bf16.mxu0 %v4044_v8  ;;  %1537 = vmatprep.subr.bf16.mxu1 %v4046_v9  ;;  %v4062_v20 = vld [vmem:[#allocation8 + $0xa4] ss:$16 sps:$4 sm:$0xff]   ;;  %v4064_v21 = vld [vmem:[#allocation8 + $0xac] ss:$16 sps:$4 sm:$0xff]   ;;  %v4066_v22 = vld [vmem:[#allocation8 + $0xa0] ss:$16 sps:$4 sm:$0xff]  }
 0x104   : > { %v4067_v23 = vld [vmem:[#allocation8 + $0xa8] ss:$16 sps:$4 sm:$0xff]   ;;  %v4068_v24 = vld [vmem:[#allocation8 + $0xc4] ss:$16 sps:$4 sm:$0xff]   ;;  %v4070_v25 = vld [vmem:[#allocation8 + $0xcc] ss:$16 sps:$4 sm:$0xff]  }
 0x105   : > { %v4072_v26 = vld [vmem:[#allocation8 + $0xc0] ss:$16 sps:$4 sm:$0xff]   ;;  %v4073_v27 = vld [vmem:[#allocation8 + $0xc8] ss:$16 sps:$4 sm:$0xff]   ;;  %v4074_v28 = vld [vmem:[#allocation8 + $0xe4] ss:$16 sps:$4 sm:$0xff]  }
 0x106   : > { %1452 = vmatpush1.bf16.msra.mxu0 %v4048_v10  ;;  %1538 = vmatpush1.bf16.msra.mxu1 %v4049_v11  ;;  %v4076_v29 = vld [vmem:[#allocation8 + $0xec] ss:$16 sps:$4 sm:$0xff]   ;;  %v4078_v30 = vld [vmem:[#allocation8 + $0xe0] ss:$16 sps:$4 sm:$0xff]   ;;  %v4079_v31 = vld [vmem:[#allocation8 + $0xe8] ss:$16 sps:$4 sm:$0xff]  }
 0x107   : > { %1453 = vmatprep.subr.bf16.mxu0 %v4050_v12  ;;  %1539 = vmatprep.subr.bf16.mxu1 %v4052_v13  ;;  %v4080_v32 = vld [vmem:[#allocation8 + $0x104] ss:$16 sps:$4 sm:$0xff]   ;;  %v4082_v33 = vld [vmem:[#allocation8 + $0x10c] ss:$16 sps:$4 sm:$0xff]   ;;  %v4084_v34 = vld [vmem:[#allocation8 + $0x100] ss:$16 sps:$4 sm:$0xff]  }
 0x108   : > { %v4085_v35 = vld [vmem:[#allocation8 + $0x108] ss:$16 sps:$4 sm:$0xff]   ;;  %v4086_v36 = vld [vmem:[#allocation8 + $0x124] ss:$16 sps:$4 sm:$0xff]   ;;  %v4088_v37 = vld [vmem:[#allocation8 + $0x12c] ss:$16 sps:$4 sm:$0xff]  }
 0x109   : > { %v4090_v38 = vld [vmem:[#allocation8 + $0x120] ss:$16 sps:$4 sm:$0xff]   ;;  %v4091_v39 = vld [vmem:[#allocation8 + $0x128] ss:$16 sps:$4 sm:$0xff]   ;;  %v4092_v40 = vld [vmem:[#allocation8 + $0x144] ss:$16 sps:$4 sm:$0xff]  }
 0x10a   : > { %1454 = vmatpush1.bf16.msra.mxu0 %v4054_v14  ;;  %1540 = vmatpush1.bf16.msra.mxu1 %v4055_v15  ;;  %v4094_v41 = vld [vmem:[#allocation8 + $0x14c] ss:$16 sps:$4 sm:$0xff]   ;;  %v4096_v42 = vld [vmem:[#allocation8 + $0x140] ss:$16 sps:$4 sm:$0xff]   ;;  %v4097_v43 = vld [vmem:[#allocation8 + $0x148] ss:$16 sps:$4 sm:$0xff]  }
 0x10b   : > { %1455 = vmatprep.subr.bf16.mxu0 %v4056_v16  ;;  %1541 = vmatprep.subr.bf16.mxu1 %v4058_v17  ;;  %v4098_v44 = vld [vmem:[#allocation8 + $0x164] ss:$16 sps:$4 sm:$0xff]   ;;  %v4100_v45 = vld [vmem:[#allocation8 + $0x16c] ss:$16 sps:$4 sm:$0xff]   ;;  %v4102_v46 = vld [vmem:[#allocation8 + $0x160] ss:$16 sps:$4 sm:$0xff]  }
 0x10c   : > { %v4103_v47 = vld [vmem:[#allocation8 + $0x168] ss:$16 sps:$4 sm:$0xff]   ;;  %v4130_v48 = vld [vmem:[%s5208_s14 + $0x4] ss:$16 sps:$4 sm:$0xff]   ;;  %v4106_v50 = vld [vmem:[#allocation8 + $0x18c] ss:$16 sps:$4 sm:$0xff]  }
 0x10d   : > { %v4104_v49 = vld [vmem:[#allocation8 + $0x184] ss:$16 sps:$4 sm:$0xff]   ;;  %1479 = vmatprep.mubr.bf16.mxu0 %v4130_v48  ;;  %1565 = vmatprep.mubr.bf16.mxu1 %v4130_v48  ;;  %v4108_v51 = vld [vmem:[#allocation8 + $0x180] ss:$16 sps:$4 sm:$0xff]   ;;  %v4109_v52 = vld [vmem:[#allocation8 + $0x188] ss:$16 sps:$4 sm:$0xff]  }
 0x10e   : > { %1456 = vmatpush1.bf16.msra.mxu0 %v4060_v18  ;;  %1542 = vmatpush1.bf16.msra.mxu1 %v4061_v19  ;;  %v4110_v53 = vld [vmem:[#allocation8 + $0x1a4] ss:$16 sps:$4 sm:$0xff]   ;;  %v4112_v54 = vld [vmem:[#allocation8 + $0x1ac] ss:$16 sps:$4 sm:$0xff]   ;;  %v4114_v55 = vld [vmem:[#allocation8 + $0x1a0] ss:$16 sps:$4 sm:$0xff]  }
 0x10f   : > { %1457 = vmatprep.subr.bf16.mxu0 %v4062_v20  ;;  %1543 = vmatprep.subr.bf16.mxu1 %v4064_v21  ;;  %v4115_v56 = vld [vmem:[#allocation8 + $0x1a8] ss:$16 sps:$4 sm:$0xff]   ;;  %v4116_v57 = vld [vmem:[#allocation8 + $0x1c4] ss:$16 sps:$4 sm:$0xff]   ;;  %v4118_v58 = vld [vmem:[#allocation8 + $0x1cc] ss:$16 sps:$4 sm:$0xff]  }
 0x110   : > { %v4120_v59 = vld [vmem:[#allocation8 + $0x1c0] ss:$16 sps:$4 sm:$0xff]   ;;  %v4121_v60 = vld [vmem:[#allocation8 + $0x1c8] ss:$16 sps:$4 sm:$0xff]   ;;  %v4122_v61 = vld [vmem:[#allocation8 + $0x1e4] ss:$16 sps:$4 sm:$0xff]  }
 0x111   : > { %v4124_v62 = vld [vmem:[#allocation8 + $0x1ec] ss:$16 sps:$4 sm:$0xff]   ;;  %v4126_v63 = vld [vmem:[#allocation8 + $0x1e0] ss:$16 sps:$4 sm:$0xff]   ;;  %v4127_v0 = vld [vmem:[#allocation8 + $0x1e8] ss:$16 sps:$4 sm:$0xff]  }
 0x112   : > { %1458 = vmatpush1.bf16.msra.mxu0 %v4066_v22  ;;  %1544 = vmatpush1.bf16.msra.mxu1 %v4067_v23  ;;  %v4133_v1 = vld [vmem:[#allocation8 + $0x204] ss:$16 sps:$4 sm:$0xff]   ;;  %v4136_v2 = vld [vmem:[#allocation8 + $0x20c] ss:$16 sps:$4 sm:$0xff]   ;;  %v4128_v3 = vld [vmem:[%s5208_s14] ss:$16 sps:$4 sm:$0xff]  }
 0x113   : > { %1459 = vmatprep.subr.bf16.mxu0 %v4068_v24  ;;  %1545 = vmatprep.subr.bf16.mxu1 %v4070_v25  ;;  %v4131_v4 = vld [vmem:[#allocation8 + $0x200] ss:$16 sps:$4 sm:$0xff]   ;;  %v4134_v5 = vld [vmem:[#allocation8 + $0x208] ss:$16 sps:$4 sm:$0xff]   ;;  %v4139_v6 = vld [vmem:[#allocation8 + $0x224] ss:$16 sps:$4 sm:$0xff]  }
 0x114   : > { %v4142_v7 = vld [vmem:[#allocation8 + $0x22c] ss:$16 sps:$4 sm:$0xff]   ;;  %v4137_v8 = vld [vmem:[#allocation8 + $0x220] ss:$16 sps:$4 sm:$0xff]   ;;  %v4140_v9 = vld [vmem:[#allocation8 + $0x228] ss:$16 sps:$4 sm:$0xff]  }
 0x115   : > { %v4145_v10 = vld [vmem:[#allocation8 + $0x244] ss:$16 sps:$4 sm:$0xff]   ;;  %v4148_v11 = vld [vmem:[#allocation8 + $0x24c] ss:$16 sps:$4 sm:$0xff]   ;;  %v4143_v12 = vld [vmem:[#allocation8 + $0x240] ss:$16 sps:$4 sm:$0xff]  }
 0x116   : > { %1460 = vmatpush1.bf16.msra.mxu0 %v4072_v26  ;;  %1546 = vmatpush1.bf16.msra.mxu1 %v4073_v27  ;;  %v4146_v13 = vld [vmem:[#allocation8 + $0x248] ss:$16 sps:$4 sm:$0xff]   ;;  %v4151_v14 = vld [vmem:[#allocation8 + $0x264] ss:$16 sps:$4 sm:$0xff]   ;;  %v4154_v15 = vld [vmem:[#allocation8 + $0x26c] ss:$16 sps:$4 sm:$0xff]  }
 0x117   : > { %1461 = vmatprep.subr.bf16.mxu0 %v4074_v28  ;;  %1547 = vmatprep.subr.bf16.mxu1 %v4076_v29  ;;  %v4149_v16 = vld [vmem:[#allocation8 + $0x260] ss:$16 sps:$4 sm:$0xff]   ;;  %v4152_v17 = vld [vmem:[#allocation8 + $0x268] ss:$16 sps:$4 sm:$0xff]   ;;  %v4157_v18 = vld [vmem:[#allocation8 + $0x284] ss:$16 sps:$4 sm:$0xff]  }
 0x118   : > { %v4160_v19 = vld [vmem:[#allocation8 + $0x28c] ss:$16 sps:$4 sm:$0xff]   ;;  %v4155_v20 = vld [vmem:[#allocation8 + $0x280] ss:$16 sps:$4 sm:$0xff]   ;;  %v4158_v21 = vld [vmem:[#allocation8 + $0x288] ss:$16 sps:$4 sm:$0xff]  }
 0x119   : > { %v4163_v22 = vld [vmem:[#allocation8 + $0x2a4] ss:$16 sps:$4 sm:$0xff]   ;;  %v4166_v23 = vld [vmem:[#allocation8 + $0x2ac] ss:$16 sps:$4 sm:$0xff]   ;;  %v4161_v24 = vld [vmem:[#allocation8 + $0x2a0] ss:$16 sps:$4 sm:$0xff]  }
 0x11a   : > { %1462 = vmatpush1.bf16.msra.mxu0 %v4078_v30  ;;  %1548 = vmatpush1.bf16.msra.mxu1 %v4079_v31  ;;  %v4164_v25 = vld [vmem:[#allocation8 + $0x2a8] ss:$16 sps:$4 sm:$0xff]   ;;  %v4169_v26 = vld [vmem:[#allocation8 + $0x2c4] ss:$16 sps:$4 sm:$0xff]   ;;  %v4172_v27 = vld [vmem:[#allocation8 + $0x2cc] ss:$16 sps:$4 sm:$0xff]  }
 0x11b   : > { %1463 = vmatprep.subr.bf16.mxu0 %v4080_v32  ;;  %1549 = vmatprep.subr.bf16.mxu1 %v4082_v33  ;;  %v4167_v28 = vld [vmem:[#allocation8 + $0x2c0] ss:$16 sps:$4 sm:$0xff]   ;;  %v4170_v29 = vld [vmem:[#allocation8 + $0x2c8] ss:$16 sps:$4 sm:$0xff]   ;;  %v4229_v30 = vld [vmem:[%s5208_s14 + $0xc] ss:$16 sps:$4 sm:$0xff]  }
 0x11c   : > { %v4175_v31 = vld [vmem:[#allocation8 + $0x2e4] ss:$16 sps:$4 sm:$0xff]   ;;  %v4178_v32 = vld [vmem:[#allocation8 + $0x2ec] ss:$16 sps:$4 sm:$0xff]   ;;  %v4173_v33 = vld [vmem:[#allocation8 + $0x2e0] ss:$16 sps:$4 sm:$0xff]  }
 0x11d   : > { %v4202_v48 = vld [vmem:[#allocation8 + $0x36c] ss:$16 sps:$4 sm:$0xff]   ;;  %vm4846_vm0 = vmmov 0   ;;  %s5371_s3 = sld [smem:[#allocation27_spill]]  ;;  %s3463_s29 = sshll.u32 %s5197_s13, 3 }
 0x11e   : > { %1464 = vmatpush1.bf16.msra.mxu0 %v4084_v34  ;;  %1550 = vmatpush1.bf16.msra.mxu1 %v4085_v35  ;;  %v4176_v34 = vld [vmem:[#allocation8 + $0x2e8] ss:$16 sps:$4 sm:$0xff]   ;;  %v4181_v35 = vld [vmem:[#allocation8 + $0x304] ss:$16 sps:$4 sm:$0xff]   ;;  %s5372_s11 = sld [smem:[#allocation29_spill]]  ;;  %s518_s8 = scalar_lea.vmem [#allocation14], %s3463_s29 }
 0x11f   : > { %1465 = vmatprep.subr.bf16.mxu0 %v4086_v36  ;;  %1551 = vmatprep.subr.bf16.mxu1 %v4088_v37  ;;  %v4184_v36 = vld [vmem:[#allocation8 + $0x30c] ss:$16 sps:$4 sm:$0xff]   ;;  %v4179_v37 = vld [vmem:[#allocation8 + $0x300] ss:$16 sps:$4 sm:$0xff]   ;;  %s3296_s0 = sshll.u32 %s518_s8, 4  ;;  %s3831_s10 = sshll.u32 %s4931_s23, 7  ;;  %s5265_s0 = int_to_ptr.vmem [resolvable:$true] %s3296_s0 }
 0x120   : > { %s5373_s27 = sld [smem:[#allocation30_spill]]  ;;  %s4748_s21 = scalar_lea.vmem %s5265_s0, 128 }
 0x121   : > { %p4749_p7 = scmp.ne.s32.totalorder %s5265_s0, %s4748_s21  ;;  %p5374_p2 = scmp.ne.s32.totalorder %s5358_s15, 0 }
 0x122   : > { %1466 = vmatpush1.bf16.msra.mxu0 %v4090_v38  ;;  %1552 = vmatpush1.bf16.msra.mxu1 %v4091_v39  ;;  %v4182_v38 = vld [vmem:[#allocation8 + $0x308] ss:$16 sps:$4 sm:$0xff]   ;;  %v4187_v39 = vld [vmem:[#allocation8 + $0x324] ss:$16 sps:$4 sm:$0xff]   ;;  %s4847_s23 = smov [#allocation14]  }
 0x123   : > { %1467 = vmatprep.subr.bf16.mxu0 %v4092_v40  ;;  %1553 = vmatprep.subr.bf16.mxu1 %v4094_v41  ;;  %v4190_v40 = vld [vmem:[#allocation8 + $0x32c] ss:$16 sps:$4 sm:$0xff]   ;;  %v4185_v41 = vld [vmem:[#allocation8 + $0x320] ss:$16 sps:$4 sm:$0xff]   ;;  %p4750_p6 = pnand %p4749_p7, %p5374_p2  ;;  %s4752_s2 = sshll.u32 %s4847_s23, 4  ;;  %s4753_s2 = int_to_ptr.vmem [resolvable:$false] %s4752_s2 }
 0x124   : > { %s4754_s5 = scalar_lea.vmem %s4753_s2, 256  ;;  %p4755_p5 = scmp.lt.s32.totalorder %s5265_s0, %s4753_s2 }
 0x125   : > { %p4751_p10 = pneg %p4750_p6  ;;  %p4756_p9 = scmp.lt.s32.totalorder %s4754_s5, %s4748_s21 }
 0x126   : > { %1468 = vmatpush1.bf16.msra.mxu0 %v4096_v42  ;;  %1554 = vmatpush1.bf16.msra.mxu1 %v4097_v43  ;;  %v4188_v42 = vld [vmem:[#allocation8 + $0x328] ss:$16 sps:$4 sm:$0xff]   ;;  %v4193_v43 = vld [vmem:[#allocation8 + $0x344] ss:$16 sps:$4 sm:$0xff]   ;;  %s5270_s24 = scalar_lea.hbm %s5373_s27, %s3831_s10 }
 0x127   : > { %1469 = vmatprep.subr.bf16.mxu0 %v4098_v44  ;;  %1555 = vmatprep.subr.bf16.mxu1 %v4100_v45  ;;  %v4196_v44 = vld [vmem:[#allocation8 + $0x34c] ss:$16 sps:$4 sm:$0xff]   ;;  %v4191_v45 = vld [vmem:[#allocation8 + $0x340] ss:$16 sps:$4 sm:$0xff]   ;;  %p4757_p4 = por %p4756_p9, %p4755_p5 }
 0x129   : > { %p4758_p8 = pnand %p4757_p4, %p4751_p10 }
 0x12a   : > { %1470 = vmatpush1.bf16.msra.mxu0 %v4102_v46  ;;  %1556 = vmatpush1.bf16.msra.mxu1 %v4103_v47  ;;  %v4194_v46 = vld [vmem:[#allocation8 + $0x348] ss:$16 sps:$4 sm:$0xff]   ;;  %v4199_v47 = vld [vmem:[#allocation8 + $0x364] ss:$16 sps:$4 sm:$0xff]  }
 0x12b   : > { %1471 = vmatprep.subr.bf16.mxu0 %v4104_v49  ;;  %1557 = vmatprep.subr.bf16.mxu1 %v4106_v50  ;;  %v4197_v49 = vld [vmem:[#allocation8 + $0x360] ss:$16 sps:$4 sm:$0xff]   ;;  %v4200_v50 = vld [vmem:[#allocation8 + $0x368] ss:$16 sps:$4 sm:$0xff]  }
 0x12e   : > { %1472 = vmatpush1.bf16.msra.mxu0 %v4108_v51  ;;  %1558 = vmatpush1.bf16.msra.mxu1 %v4109_v52  ;;  %v4205_v51 = vld [vmem:[#allocation8 + $0x384] ss:$16 sps:$4 sm:$0xff]   ;;  %v4208_v52 = vld [vmem:[#allocation8 + $0x38c] ss:$16 sps:$4 sm:$0xff]  }
 0x12f   : > { %1473 = vmatprep.subr.bf16.mxu0 %v4110_v53  ;;  %1559 = vmatprep.subr.bf16.mxu1 %v4112_v54  ;;  %v4203_v53 = vld [vmem:[#allocation8 + $0x380] ss:$16 sps:$4 sm:$0xff]   ;;  %v4206_v54 = vld [vmem:[#allocation8 + $0x388] ss:$16 sps:$4 sm:$0xff]  }
 0x132   : > { %1474 = vmatpush1.bf16.msra.mxu0 %v4114_v55  ;;  %1560 = vmatpush1.bf16.msra.mxu1 %v4115_v56  ;;  %v4211_v55 = vld [vmem:[#allocation8 + $0x3a4] ss:$16 sps:$4 sm:$0xff]   ;;  %v4214_v56 = vld [vmem:[#allocation8 + $0x3ac] ss:$16 sps:$4 sm:$0xff]  }
 0x133   : > { %1475 = vmatprep.subr.bf16.mxu0 %v4116_v57  ;;  %1561 = vmatprep.subr.bf16.mxu1 %v4118_v58  ;;  %v4209_v57 = vld [vmem:[#allocation8 + $0x3a0] ss:$16 sps:$4 sm:$0xff]   ;;  %v4212_v58 = vld [vmem:[#allocation8 + $0x3a8] ss:$16 sps:$4 sm:$0xff]  }
 0x136   : > { %1476 = vmatpush1.bf16.msra.mxu0 %v4120_v59  ;;  %1562 = vmatpush1.bf16.msra.mxu1 %v4121_v60  ;;  %v4217_v59 = vld [vmem:[#allocation8 + $0x3c4] ss:$16 sps:$4 sm:$0xff]   ;;  %v4220_v60 = vld [vmem:[#allocation8 + $0x3cc] ss:$16 sps:$4 sm:$0xff]  }
 0x137   : > { %1477 = vmatprep.subr.bf16.mxu0 %v4122_v61  ;;  %1563 = vmatprep.subr.bf16.mxu1 %v4124_v62  ;;  %v4215_v61 = vld [vmem:[#allocation8 + $0x3c0] ss:$16 sps:$4 sm:$0xff]   ;;  %v4218_v62 = vld [vmem:[#allocation8 + $0x3c8] ss:$16 sps:$4 sm:$0xff]  }
 0x13a   : > { %1478 = vmatpush1.bf16.msra.mxu0 %v4126_v63  ;;  %1564 = vmatpush1.bf16.msra.mxu1 %v4127_v0  ;;  %v4223_v63 = vld [vmem:[#allocation8 + $0x3e4] ss:$16 sps:$4 sm:$0xff]   ;;  %v4226_v0 = vld [vmem:[#allocation8 + $0x3ec] ss:$16 sps:$4 sm:$0xff]  }
 0x13b   : > { %1490 = vmatprep.subr.bf16.mxu0 %v4133_v1  ;;  %1576 = vmatprep.subr.bf16.mxu1 %v4136_v2  ;;  %v4221_v1 = vld [vmem:[#allocation8 + $0x3e0] ss:$16 sps:$4 sm:$0xff]   ;;  %v4224_v2 = vld [vmem:[#allocation8 + $0x3e8] ss:$16 sps:$4 sm:$0xff]  }
 0x13d   : > { %1480 = vmatmul.mubr.bf16.vlgmr.msra.gmra.mrb[0].mxu0 %v4128_v3  ;;  %1566 = vmatmul.mubr.bf16.vlgmr.msra.gmra.mrb[0].mxu1 %v4128_v3  ;;  %v4232_v3 = vld [vmem:[#allocation7 + $0x4] ss:$16 sps:$4 sm:$0xff]  }
 0x13e   : > { %1491 = vmatpush1.bf16.msra.mxu0 %v4131_v4  ;;  %1577 = vmatpush1.bf16.msra.mxu1 %v4134_v5  ;;  %v4235_v4 = vld [vmem:[#allocation7 + $0xc] ss:$16 sps:$4 sm:$0xff]   ;;  %v4227_v5 = vld [vmem:[%s5208_s14 + $0x8] ss:$16 sps:$4 sm:$0xff]   ;;  %s3283_s14 = scalar_lea.sflag [#allocation4], %s5197_s13 }
 0x13f   : > { %1492 = vmatprep.subr.bf16.mxu0 %v4139_v6  ;;  %1578 = vmatprep.subr.bf16.mxu1 %v4142_v7  ;;  %v4230_v6 = vld [vmem:[#allocation7] ss:$16 sps:$4 sm:$0xff]   ;;  %v4233_v7 = vld [vmem:[#allocation7 + $0x8] ss:$16 sps:$4 sm:$0xff]  }
 0x140   : > { %1522 = vmatprep.mubr.bf16.mxu0 %v4229_v30  ;;  %1608 = vmatprep.mubr.bf16.mxu1 %v4229_v30  ;;  %v4271_v30 = vld [vmem:[#allocation7 + $0xcc] ss:$16 sps:$4 sm:$0xff]  }
 0x142   : > { %1493 = vmatpush1.bf16.msra.mxu0 %v4137_v8  ;;  %1579 = vmatpush1.bf16.msra.mxu1 %v4140_v9  ;;  %v4238_v8 = vld [vmem:[#allocation7 + $0x24] ss:$16 sps:$4 sm:$0xff]   ;;  %v4241_v9 = vld [vmem:[#allocation7 + $0x2c] ss:$16 sps:$4 sm:$0xff]  }
 0x143   : > { %1494 = vmatprep.subr.bf16.mxu0 %v4145_v10  ;;  %1580 = vmatprep.subr.bf16.mxu1 %v4148_v11  ;;  %v4236_v10 = vld [vmem:[#allocation7 + $0x20] ss:$16 sps:$4 sm:$0xff]   ;;  %v4239_v11 = vld [vmem:[#allocation7 + $0x28] ss:$16 sps:$4 sm:$0xff]  }
 0x146   : > { %1495 = vmatpush1.bf16.msra.mxu0 %v4143_v12  ;;  %1581 = vmatpush1.bf16.msra.mxu1 %v4146_v13  ;;  %v4328_v12 = vld [vmem:[%s5201_s12 + $0x4] ss:$16 sps:$4 sm:$0xff]  }
 0x147   : > { %1496 = vmatprep.subr.bf16.mxu0 %v4151_v14  ;;  %1582 = vmatprep.subr.bf16.mxu1 %v4154_v15  ;;  %v4244_v13 = vld [vmem:[#allocation7 + $0x44] ss:$16 sps:$4 sm:$0xff]   ;;  %v4247_v14 = vld [vmem:[#allocation7 + $0x4c] ss:$16 sps:$4 sm:$0xff]   ;;  %v4242_v15 = vld [vmem:[#allocation7 + $0x40] ss:$16 sps:$4 sm:$0xff]  }
 0x14a   : > { %1497 = vmatpush1.bf16.msra.mxu0 %v4149_v16  ;;  %1583 = vmatpush1.bf16.msra.mxu1 %v4152_v17  ;;  %v4245_v16 = vld [vmem:[#allocation7 + $0x48] ss:$16 sps:$4 sm:$0xff]   ;;  %v4250_v17 = vld [vmem:[#allocation7 + $0x64] ss:$16 sps:$4 sm:$0xff]  }
 0x14b   : > { %1498 = vmatprep.subr.bf16.mxu0 %v4157_v18  ;;  %1584 = vmatprep.subr.bf16.mxu1 %v4160_v19  ;;  %v4253_v18 = vld [vmem:[#allocation7 + $0x6c] ss:$16 sps:$4 sm:$0xff]   ;;  %v4248_v19 = vld [vmem:[#allocation7 + $0x60] ss:$16 sps:$4 sm:$0xff]  }
 0x14e   : > { %1499 = vmatpush1.bf16.msra.mxu0 %v4155_v20  ;;  %1585 = vmatpush1.bf16.msra.mxu1 %v4158_v21  ;;  %v4251_v20 = vld [vmem:[#allocation7 + $0x68] ss:$16 sps:$4 sm:$0xff]   ;;  %v4256_v21 = vld [vmem:[#allocation7 + $0x84] ss:$16 sps:$4 sm:$0xff]  }
 0x14f   : > { %1500 = vmatprep.subr.bf16.mxu0 %v4163_v22  ;;  %1586 = vmatprep.subr.bf16.mxu1 %v4166_v23  ;;  %v4259_v22 = vld [vmem:[#allocation7 + $0x8c] ss:$16 sps:$4 sm:$0xff]   ;;  %v4254_v23 = vld [vmem:[#allocation7 + $0x80] ss:$16 sps:$4 sm:$0xff]  }
 0x152   : > { %1501 = vmatpush1.bf16.msra.mxu0 %v4161_v24  ;;  %1587 = vmatpush1.bf16.msra.mxu1 %v4164_v25  ;;  %v4257_v24 = vld [vmem:[#allocation7 + $0x88] ss:$16 sps:$4 sm:$0xff]   ;;  %v4262_v25 = vld [vmem:[#allocation7 + $0xa4] ss:$16 sps:$4 sm:$0xff]  }
 0x153   : > { %1502 = vmatprep.subr.bf16.mxu0 %v4169_v26  ;;  %1588 = vmatprep.subr.bf16.mxu1 %v4172_v27  ;;  %v4265_v26 = vld [vmem:[#allocation7 + $0xac] ss:$16 sps:$4 sm:$0xff]   ;;  %v4260_v27 = vld [vmem:[#allocation7 + $0xa0] ss:$16 sps:$4 sm:$0xff]  }
 0x156   : > { %1503 = vmatpush1.bf16.msra.mxu0 %v4167_v28  ;;  %1589 = vmatpush1.bf16.msra.mxu1 %v4170_v29  ;;  %v4263_v28 = vld [vmem:[#allocation7 + $0xa8] ss:$16 sps:$4 sm:$0xff]   ;;  %v4268_v29 = vld [vmem:[#allocation7 + $0xc4] ss:$16 sps:$4 sm:$0xff]  }
 0x157   : > { %1504 = vmatprep.subr.bf16.mxu0 %v4175_v31  ;;  %1590 = vmatprep.subr.bf16.mxu1 %v4178_v32  ;;  %v4266_v31 = vld [vmem:[#allocation7 + $0xc0] ss:$16 sps:$4 sm:$0xff]   ;;  %v4269_v32 = vld [vmem:[#allocation7 + $0xc8] ss:$16 sps:$4 sm:$0xff]  }
 0x15a   : > { %1505 = vmatpush1.bf16.msra.mxu0 %v4173_v33  ;;  %1591 = vmatpush1.bf16.msra.mxu1 %v4176_v34  ;;  %v4274_v33 = vld [vmem:[#allocation7 + $0xe4] ss:$16 sps:$4 sm:$0xff]   ;;  %v4277_v34 = vld [vmem:[#allocation7 + $0xec] ss:$16 sps:$4 sm:$0xff]  }
 0x15b   : > { %1506 = vmatprep.subr.bf16.mxu0 %v4181_v35  ;;  %1592 = vmatprep.subr.bf16.mxu1 %v4184_v36  ;;  %v4272_v35 = vld [vmem:[#allocation7 + $0xe0] ss:$16 sps:$4 sm:$0xff]   ;;  %v4275_v36 = vld [vmem:[#allocation7 + $0xe8] ss:$16 sps:$4 sm:$0xff]  }
 0x15e   : > { %1507 = vmatpush1.bf16.msra.mxu0 %v4179_v37  ;;  %1593 = vmatpush1.bf16.msra.mxu1 %v4182_v38  ;;  %v4280_v37 = vld [vmem:[#allocation7 + $0x104] ss:$16 sps:$4 sm:$0xff]   ;;  %v4283_v38 = vld [vmem:[#allocation7 + $0x10c] ss:$16 sps:$4 sm:$0xff]  }
 0x15f   : > { %1508 = vmatprep.subr.bf16.mxu0 %v4187_v39  ;;  %1594 = vmatprep.subr.bf16.mxu1 %v4190_v40  ;;  %v4278_v39 = vld [vmem:[#allocation7 + $0x100] ss:$16 sps:$4 sm:$0xff]   ;;  %v4281_v40 = vld [vmem:[#allocation7 + $0x108] ss:$16 sps:$4 sm:$0xff]  }
 0x162   : > { %1509 = vmatpush1.bf16.msra.mxu0 %v4185_v41  ;;  %1595 = vmatpush1.bf16.msra.mxu1 %v4188_v42  ;;  %v4286_v41 = vld [vmem:[#allocation7 + $0x124] ss:$16 sps:$4 sm:$0xff]   ;;  %v4289_v42 = vld [vmem:[#allocation7 + $0x12c] ss:$16 sps:$4 sm:$0xff]  }
 0x163   : > { %1510 = vmatprep.subr.bf16.mxu0 %v4193_v43  ;;  %1596 = vmatprep.subr.bf16.mxu1 %v4196_v44  ;;  %v4284_v43 = vld [vmem:[#allocation7 + $0x120] ss:$16 sps:$4 sm:$0xff]   ;;  %v4287_v44 = vld [vmem:[#allocation7 + $0x128] ss:$16 sps:$4 sm:$0xff]  }
 0x166   : > { %1511 = vmatpush1.bf16.msra.mxu0 %v4191_v45  ;;  %1597 = vmatpush1.bf16.msra.mxu1 %v4194_v46  ;;  %v4292_v45 = vld [vmem:[#allocation7 + $0x144] ss:$16 sps:$4 sm:$0xff]   ;;  %v4295_v46 = vld [vmem:[#allocation7 + $0x14c] ss:$16 sps:$4 sm:$0xff]  }
 0x167   : > { %1512 = vmatprep.subr.bf16.mxu0 %v4199_v47  ;;  %1598 = vmatprep.subr.bf16.mxu1 %v4202_v48  ;;  %v4290_v47 = vld [vmem:[#allocation7 + $0x140] ss:$16 sps:$4 sm:$0xff]   ;;  %v4293_v48 = vld [vmem:[#allocation7 + $0x148] ss:$16 sps:$4 sm:$0xff]  }
 0x16a   : > { %1513 = vmatpush1.bf16.msra.mxu0 %v4197_v49  ;;  %1599 = vmatpush1.bf16.msra.mxu1 %v4200_v50  ;;  %v4298_v49 = vld [vmem:[#allocation7 + $0x164] ss:$16 sps:$4 sm:$0xff]   ;;  %v4301_v50 = vld [vmem:[#allocation7 + $0x16c] ss:$16 sps:$4 sm:$0xff]  }
 0x16b   : > { %1514 = vmatprep.subr.bf16.mxu0 %v4205_v51  ;;  %1600 = vmatprep.subr.bf16.mxu1 %v4208_v52  ;;  %v4296_v51 = vld [vmem:[#allocation7 + $0x160] ss:$16 sps:$4 sm:$0xff]   ;;  %v4299_v52 = vld [vmem:[#allocation7 + $0x168] ss:$16 sps:$4 sm:$0xff]  }
 0x16e   : > { %1515 = vmatpush1.bf16.msra.mxu0 %v4203_v53  ;;  %1601 = vmatpush1.bf16.msra.mxu1 %v4206_v54  ;;  %v4304_v53 = vld [vmem:[#allocation7 + $0x184] ss:$16 sps:$4 sm:$0xff]   ;;  %v4307_v54 = vld [vmem:[#allocation7 + $0x18c] ss:$16 sps:$4 sm:$0xff]  }
 0x16f   : > { %1516 = vmatprep.subr.bf16.mxu0 %v4211_v55  ;;  %1602 = vmatprep.subr.bf16.mxu1 %v4214_v56  ;;  %v4302_v55 = vld [vmem:[#allocation7 + $0x180] ss:$16 sps:$4 sm:$0xff]   ;;  %v4305_v56 = vld [vmem:[#allocation7 + $0x188] ss:$16 sps:$4 sm:$0xff]  }
 0x172   : > { %1517 = vmatpush1.bf16.msra.mxu0 %v4209_v57  ;;  %1603 = vmatpush1.bf16.msra.mxu1 %v4212_v58  ;;  %v4310_v57 = vld [vmem:[#allocation7 + $0x1a4] ss:$16 sps:$4 sm:$0xff]   ;;  %v4313_v58 = vld [vmem:[#allocation7 + $0x1ac] ss:$16 sps:$4 sm:$0xff]  }
 0x173   : > { %1518 = vmatprep.subr.bf16.mxu0 %v4217_v59  ;;  %1604 = vmatprep.subr.bf16.mxu1 %v4220_v60  ;;  %v4308_v59 = vld [vmem:[#allocation7 + $0x1a0] ss:$16 sps:$4 sm:$0xff]   ;;  %v4311_v60 = vld [vmem:[#allocation7 + $0x1a8] ss:$16 sps:$4 sm:$0xff]  }
 0x176   : > { %1519 = vmatpush1.bf16.msra.mxu0 %v4215_v61  ;;  %1605 = vmatpush1.bf16.msra.mxu1 %v4218_v62  ;;  %v4316_v61 = vld [vmem:[#allocation7 + $0x1c4] ss:$16 sps:$4 sm:$0xff]   ;;  %v4319_v62 = vld [vmem:[#allocation7 + $0x1cc] ss:$16 sps:$4 sm:$0xff]  }
 0x177   : > { %1520 = vmatprep.subr.bf16.mxu0 %v4223_v63  ;;  %1606 = vmatprep.subr.bf16.mxu1 %v4226_v0  ;;  %v4314_v63 = vld [vmem:[#allocation7 + $0x1c0] ss:$16 sps:$4 sm:$0xff]   ;;  %v4317_v0 = vld [vmem:[#allocation7 + $0x1c8] ss:$16 sps:$4 sm:$0xff]  }
 0x17a   : > { %1521 = vmatpush1.bf16.msra.mxu0 %v4221_v1  ;;  %1607 = vmatpush1.bf16.msra.mxu1 %v4224_v2  ;;  %v4322_v1 = vld [vmem:[#allocation7 + $0x1e4] ss:$16 sps:$4 sm:$0xff]   ;;  %v4325_v2 = vld [vmem:[#allocation7 + $0x1ec] ss:$16 sps:$4 sm:$0xff]  }
 0x17b   : > { %2279 = vmatprep.subr.bf16.mxu0 %v4232_v3  ;;  %2365 = vmatprep.subr.bf16.mxu1 %v4235_v4  ;;  %v4320_v3 = vld [vmem:[#allocation7 + $0x1e0] ss:$16 sps:$4 sm:$0xff]   ;;  %v4323_v4 = vld [vmem:[#allocation7 + $0x1e8] ss:$16 sps:$4 sm:$0xff]  }
 0x17d   : > { %1523 = vmatmul.mubr.bf16.vlgmr.msra.gmra.mrb[0].mxu0 %v4227_v5  ;;  %1609 = vmatmul.mubr.bf16.vlgmr.msra.gmra.mrb[0].mxu1 %v4227_v5  ;;  %v4331_v5 = vld [vmem:[#allocation7 + $0x204] ss:$16 sps:$4 sm:$0xff]  }
 0x17e   : > { %2280 = vmatpush1.bf16.msra.mxu0 %v4230_v6  ;;  %2366 = vmatpush1.bf16.msra.mxu1 %v4233_v7  ;;  %v4334_v6 = vld [vmem:[#allocation7 + $0x20c] ss:$16 sps:$4 sm:$0xff]   ;;  %v4326_v7 = vld [vmem:[%s5201_s12] ss:$16 sps:$4 sm:$0xff]  }
 0x17f   : > { %2281 = vmatprep.subr.bf16.mxu0 %v4238_v8  ;;  %2367 = vmatprep.subr.bf16.mxu1 %v4241_v9  ;;  %v4329_v8 = vld [vmem:[#allocation7 + $0x200] ss:$16 sps:$4 sm:$0xff]   ;;  %v4332_v9 = vld [vmem:[#allocation7 + $0x208] ss:$16 sps:$4 sm:$0xff]  }
 0x180   : > { %2311 = vmatprep.mubr.bf16.mxu0 %v4328_v12  ;;  %2397 = vmatprep.mubr.bf16.mxu1 %v4328_v12  ;;  %v4335_v12 = vld [vmem:[#allocation7 + $0x220] ss:$16 sps:$4 sm:$0xff]  }
 0x182   : > { %2282 = vmatpush1.bf16.msra.mxu0 %v4236_v10  ;;  %2368 = vmatpush1.bf16.msra.mxu1 %v4239_v11  ;;  %v4337_v10 = vld [vmem:[#allocation7 + $0x224] ss:$16 sps:$4 sm:$0xff]   ;;  %v4340_v11 = vld [vmem:[#allocation7 + $0x22c] ss:$16 sps:$4 sm:$0xff]  }
 0x183   : > { %2283 = vmatprep.subr.bf16.mxu0 %v4244_v13  ;;  %2369 = vmatprep.subr.bf16.mxu1 %v4247_v14  ;;  %v4338_v13 = vld [vmem:[#allocation7 + $0x228] ss:$16 sps:$4 sm:$0xff]   ;;  %v4427_v14 = vld [vmem:[%s5201_s12 + $0xc] ss:$16 sps:$4 sm:$0xff]  }
 0x186   : > { %2284 = vmatpush1.bf16.msra.mxu0 %v4242_v15  ;;  %2370 = vmatpush1.bf16.msra.mxu1 %v4245_v16  ;;  %v4343_v15 = vld [vmem:[#allocation7 + $0x244] ss:$16 sps:$4 sm:$0xff]   ;;  %v4346_v16 = vld [vmem:[#allocation7 + $0x24c] ss:$16 sps:$4 sm:$0xff]  }
 0x187   : > { %2285 = vmatprep.subr.bf16.mxu0 %v4250_v17  ;;  %2371 = vmatprep.subr.bf16.mxu1 %v4253_v18  ;;  %v4341_v17 = vld [vmem:[#allocation7 + $0x240] ss:$16 sps:$4 sm:$0xff]   ;;  %v4344_v18 = vld [vmem:[#allocation7 + $0x248] ss:$16 sps:$4 sm:$0xff]  }
 0x18a   : > { %2286 = vmatpush1.bf16.msra.mxu0 %v4248_v19  ;;  %2372 = vmatpush1.bf16.msra.mxu1 %v4251_v20  ;;  %v4349_v19 = vld [vmem:[#allocation7 + $0x264] ss:$16 sps:$4 sm:$0xff]   ;;  %v4352_v20 = vld [vmem:[#allocation7 + $0x26c] ss:$16 sps:$4 sm:$0xff]  }
 0x18b   : > { %2287 = vmatprep.subr.bf16.mxu0 %v4256_v21  ;;  %2373 = vmatprep.subr.bf16.mxu1 %v4259_v22  ;;  %v4347_v21 = vld [vmem:[#allocation7 + $0x260] ss:$16 sps:$4 sm:$0xff]   ;;  %v4350_v22 = vld [vmem:[#allocation7 + $0x268] ss:$16 sps:$4 sm:$0xff]  }
 0x18e   : > { %2288 = vmatpush1.bf16.msra.mxu0 %v4254_v23  ;;  %2374 = vmatpush1.bf16.msra.mxu1 %v4257_v24  ;;  %v4355_v23 = vld [vmem:[#allocation7 + $0x284] ss:$16 sps:$4 sm:$0xff]   ;;  %v4358_v24 = vld [vmem:[#allocation7 + $0x28c] ss:$16 sps:$4 sm:$0xff]  }
 0x18f   : > { %2289 = vmatprep.subr.bf16.mxu0 %v4262_v25  ;;  %2375 = vmatprep.subr.bf16.mxu1 %v4265_v26  ;;  %v4353_v25 = vld [vmem:[#allocation7 + $0x280] ss:$16 sps:$4 sm:$0xff]   ;;  %v4356_v26 = vld [vmem:[#allocation7 + $0x288] ss:$16 sps:$4 sm:$0xff]  }
 0x192   : > { %2290 = vmatpush1.bf16.msra.mxu0 %v4260_v27  ;;  %2376 = vmatpush1.bf16.msra.mxu1 %v4263_v28  ;;  %v4361_v27 = vld [vmem:[#allocation7 + $0x2a4] ss:$16 sps:$4 sm:$0xff]   ;;  %v4364_v28 = vld [vmem:[#allocation7 + $0x2ac] ss:$16 sps:$4 sm:$0xff]  }
 0x193   : > { %2291 = vmatprep.subr.bf16.mxu0 %v4268_v29  ;;  %2377 = vmatprep.subr.bf16.mxu1 %v4271_v30  ;;  %v4359_v29 = vld [vmem:[#allocation7 + $0x2a0] ss:$16 sps:$4 sm:$0xff]   ;;  %v4362_v30 = vld [vmem:[#allocation7 + $0x2a8] ss:$16 sps:$4 sm:$0xff]  }
 0x196   : > { %2292 = vmatpush1.bf16.msra.mxu0 %v4266_v31  ;;  %2378 = vmatpush1.bf16.msra.mxu1 %v4269_v32  ;;  %v4367_v31 = vld [vmem:[#allocation7 + $0x2c4] ss:$16 sps:$4 sm:$0xff]   ;;  %v4370_v32 = vld [vmem:[#allocation7 + $0x2cc] ss:$16 sps:$4 sm:$0xff]  }
 0x197   : > { %2293 = vmatprep.subr.bf16.mxu0 %v4274_v33  ;;  %2379 = vmatprep.subr.bf16.mxu1 %v4277_v34  ;;  %v4365_v33 = vld [vmem:[#allocation7 + $0x2c0] ss:$16 sps:$4 sm:$0xff]   ;;  %v4368_v34 = vld [vmem:[#allocation7 + $0x2c8] ss:$16 sps:$4 sm:$0xff]  }
 0x19a   : > { %2294 = vmatpush1.bf16.msra.mxu0 %v4272_v35  ;;  %2380 = vmatpush1.bf16.msra.mxu1 %v4275_v36  ;;  %v4373_v35 = vld [vmem:[#allocation7 + $0x2e4] ss:$16 sps:$4 sm:$0xff]   ;;  %v4376_v36 = vld [vmem:[#allocation7 + $0x2ec] ss:$16 sps:$4 sm:$0xff]  }
 0x19b   : > { %2295 = vmatprep.subr.bf16.mxu0 %v4280_v37  ;;  %2381 = vmatprep.subr.bf16.mxu1 %v4283_v38  ;;  %v4371_v37 = vld [vmem:[#allocation7 + $0x2e0] ss:$16 sps:$4 sm:$0xff]   ;;  %v4374_v38 = vld [vmem:[#allocation7 + $0x2e8] ss:$16 sps:$4 sm:$0xff]  }
 0x19e   : > { %2296 = vmatpush1.bf16.msra.mxu0 %v4278_v39  ;;  %2382 = vmatpush1.bf16.msra.mxu1 %v4281_v40  ;;  %v4379_v39 = vld [vmem:[#allocation7 + $0x304] ss:$16 sps:$4 sm:$0xff]   ;;  %v4382_v40 = vld [vmem:[#allocation7 + $0x30c] ss:$16 sps:$4 sm:$0xff]  }
 0x19f   : > { %2297 = vmatprep.subr.bf16.mxu0 %v4286_v41  ;;  %2383 = vmatprep.subr.bf16.mxu1 %v4289_v42  ;;  %v4377_v41 = vld [vmem:[#allocation7 + $0x300] ss:$16 sps:$4 sm:$0xff]   ;;  %v4380_v42 = vld [vmem:[#allocation7 + $0x308] ss:$16 sps:$4 sm:$0xff]  }
 0x1a2   : > { %2298 = vmatpush1.bf16.msra.mxu0 %v4284_v43  ;;  %2384 = vmatpush1.bf16.msra.mxu1 %v4287_v44  ;;  %v4385_v43 = vld [vmem:[#allocation7 + $0x324] ss:$16 sps:$4 sm:$0xff]   ;;  %v4388_v44 = vld [vmem:[#allocation7 + $0x32c] ss:$16 sps:$4 sm:$0xff]  }
 0x1a3   : > { %2299 = vmatprep.subr.bf16.mxu0 %v4292_v45  ;;  %2385 = vmatprep.subr.bf16.mxu1 %v4295_v46  ;;  %v4383_v45 = vld [vmem:[#allocation7 + $0x320] ss:$16 sps:$4 sm:$0xff]   ;;  %v4386_v46 = vld [vmem:[#allocation7 + $0x328] ss:$16 sps:$4 sm:$0xff]  }
 0x1a6   : > { %2300 = vmatpush1.bf16.msra.mxu0 %v4290_v47  ;;  %2386 = vmatpush1.bf16.msra.mxu1 %v4293_v48  ;;  %v4391_v47 = vld [vmem:[#allocation7 + $0x344] ss:$16 sps:$4 sm:$0xff]   ;;  %v4394_v48 = vld [vmem:[#allocation7 + $0x34c] ss:$16 sps:$4 sm:$0xff]  }
 0x1a7   : > { %2301 = vmatprep.subr.bf16.mxu0 %v4298_v49  ;;  %2387 = vmatprep.subr.bf16.mxu1 %v4301_v50  ;;  %v4389_v49 = vld [vmem:[#allocation7 + $0x340] ss:$16 sps:$4 sm:$0xff]   ;;  %v4392_v50 = vld [vmem:[#allocation7 + $0x348] ss:$16 sps:$4 sm:$0xff]  }
 0x1aa   : > { %2302 = vmatpush1.bf16.msra.mxu0 %v4296_v51  ;;  %2388 = vmatpush1.bf16.msra.mxu1 %v4299_v52  ;;  %v4397_v51 = vld [vmem:[#allocation7 + $0x364] ss:$16 sps:$4 sm:$0xff]   ;;  %v4400_v52 = vld [vmem:[#allocation7 + $0x36c] ss:$16 sps:$4 sm:$0xff]  }
 0x1ab   : > { %2303 = vmatprep.subr.bf16.mxu0 %v4304_v53  ;;  %2389 = vmatprep.subr.bf16.mxu1 %v4307_v54  ;;  %v4395_v53 = vld [vmem:[#allocation7 + $0x360] ss:$16 sps:$4 sm:$0xff]   ;;  %v4398_v54 = vld [vmem:[#allocation7 + $0x368] ss:$16 sps:$4 sm:$0xff]  }
 0x1ae   : > { %2304 = vmatpush1.bf16.msra.mxu0 %v4302_v55  ;;  %2390 = vmatpush1.bf16.msra.mxu1 %v4305_v56  ;;  %v4403_v55 = vld [vmem:[#allocation7 + $0x384] ss:$16 sps:$4 sm:$0xff]   ;;  %v4406_v56 = vld [vmem:[#allocation7 + $0x38c] ss:$16 sps:$4 sm:$0xff]  }
 0x1af   : > { %2305 = vmatprep.subr.bf16.mxu0 %v4310_v57  ;;  %2391 = vmatprep.subr.bf16.mxu1 %v4313_v58  ;;  %v4401_v57 = vld [vmem:[#allocation7 + $0x380] ss:$16 sps:$4 sm:$0xff]   ;;  %v4404_v58 = vld [vmem:[#allocation7 + $0x388] ss:$16 sps:$4 sm:$0xff]  }
 0x1b2   : > { %2306 = vmatpush1.bf16.msra.mxu0 %v4308_v59  ;;  %2392 = vmatpush1.bf16.msra.mxu1 %v4311_v60  ;;  %v4409_v59 = vld [vmem:[#allocation7 + $0x3a4] ss:$16 sps:$4 sm:$0xff]   ;;  %v4412_v60 = vld [vmem:[#allocation7 + $0x3ac] ss:$16 sps:$4 sm:$0xff]  }
 0x1b3   : > { %2307 = vmatprep.subr.bf16.mxu0 %v4316_v61  ;;  %2393 = vmatprep.subr.bf16.mxu1 %v4319_v62  ;;  %v4407_v61 = vld [vmem:[#allocation7 + $0x3a0] ss:$16 sps:$4 sm:$0xff]   ;;  %v4410_v62 = vld [vmem:[#allocation7 + $0x3a8] ss:$16 sps:$4 sm:$0xff]  }
 0x1b6   : > { %2308 = vmatpush1.bf16.msra.mxu0 %v4314_v63  ;;  %2394 = vmatpush1.bf16.msra.mxu1 %v4317_v0  ;;  %v4415_v63 = vld [vmem:[#allocation7 + $0x3c4] ss:$16 sps:$4 sm:$0xff]   ;;  %v4418_v0 = vld [vmem:[#allocation7 + $0x3cc] ss:$16 sps:$4 sm:$0xff]  }
 0x1b7   : > { %2309 = vmatprep.subr.bf16.mxu0 %v4322_v1  ;;  %2395 = vmatprep.subr.bf16.mxu1 %v4325_v2  ;;  %v4413_v1 = vld [vmem:[#allocation7 + $0x3c0] ss:$16 sps:$4 sm:$0xff]   ;;  %v4416_v2 = vld [vmem:[#allocation7 + $0x3c8] ss:$16 sps:$4 sm:$0xff]  }
 0x1ba   : > { %2310 = vmatpush1.bf16.msra.mxu0 %v4320_v3  ;;  %2396 = vmatpush1.bf16.msra.mxu1 %v4323_v4  ;;  %v4421_v3 = vld [vmem:[#allocation7 + $0x3e4] ss:$16 sps:$4 sm:$0xff]   ;;  %v4424_v4 = vld [vmem:[#allocation7 + $0x3ec] ss:$16 sps:$4 sm:$0xff]  }
 0x1bb   : > { %2322 = vmatprep.subr.bf16.mxu0 %v4331_v5  ;;  %2408 = vmatprep.subr.bf16.mxu1 %v4334_v6  ;;  %v4419_v5 = vld [vmem:[#allocation7 + $0x3e0] ss:$16 sps:$4 sm:$0xff]   ;;  %v4422_v6 = vld [vmem:[#allocation7 + $0x3e8] ss:$16 sps:$4 sm:$0xff]  }
 0x1bd   : > { %2312 = vmatmul.mubr.bf16.vlgmr.msra.gmra.mrb[0].mxu0 %v4326_v7  ;;  %2398 = vmatmul.mubr.bf16.vlgmr.msra.gmra.mrb[0].mxu1 %v4326_v7  ;;  %v4430_v7 = vld [vmem:[#allocation10 + $0x4] ss:$8 sps:$4 sm:$0xff]  }
 0x1be   : > { %2323 = vmatpush1.bf16.msra.mxu0 %v4329_v8  ;;  %2409 = vmatpush1.bf16.msra.mxu1 %v4332_v9  ;;  %v4425_v8 = vld [vmem:[%s5201_s12 + $0x8] ss:$16 sps:$4 sm:$0xff]  }
 0x1bf   : > { %2324 = vmatprep.subr.bf16.mxu0 %v4337_v10  ;;  %2410 = vmatprep.subr.bf16.mxu1 %v4340_v11  ;;  %v4428_v9 = vld [vmem:[#allocation10] ss:$8 sps:$4 sm:$0xff]   ;;  %v4433_v10 = vld [vmem:[#allocation10 + $0x14] ss:$8 sps:$4 sm:$0xff]   ;;  %v4431_v11 = vld [vmem:[#allocation10 + $0x10] ss:$8 sps:$4 sm:$0xff]  }
 0x1c0   : > { %2354 = vmatprep.mubr.bf16.mxu0 %v4427_v14  ;;  %2440 = vmatprep.mubr.bf16.mxu1 %v4427_v14  ;;  %v4439_v14 = vld [vmem:[#allocation10 + $0x34] ss:$8 sps:$4 sm:$0xff]  }
 0x1c2   : > { %2325 = vmatpush1.bf16.msra.mxu0 %v4335_v12  ;;  %2411 = vmatpush1.bf16.msra.mxu1 %v4338_v13  ;;  %v4436_v12 = vld [vmem:[#allocation10 + $0x24] ss:$8 sps:$4 sm:$0xff]   ;;  %v4434_v13 = vld [vmem:[#allocation10 + $0x20] ss:$8 sps:$4 sm:$0xff]  }
 0x1c3   : > { %2326 = vmatprep.subr.bf16.mxu0 %v4343_v15  ;;  %2412 = vmatprep.subr.bf16.mxu1 %v4346_v16  ;;  %v4437_v15 = vld [vmem:[#allocation10 + $0x30] ss:$8 sps:$4 sm:$0xff]   ;;  %v4442_v16 = vld [vmem:[#allocation10 + $0x44] ss:$8 sps:$4 sm:$0xff]  }
 0x1c6   : > { %2327 = vmatpush1.bf16.msra.mxu0 %v4341_v17  ;;  %2413 = vmatpush1.bf16.msra.mxu1 %v4344_v18  ;;  %v4440_v17 = vld [vmem:[#allocation10 + $0x40] ss:$8 sps:$4 sm:$0xff]   ;;  %v4445_v18 = vld [vmem:[#allocation10 + $0x54] ss:$8 sps:$4 sm:$0xff]  }
 0x1c7   : > { %2328 = vmatprep.subr.bf16.mxu0 %v4349_v19  ;;  %2414 = vmatprep.subr.bf16.mxu1 %v4352_v20  ;;  %v4443_v19 = vld [vmem:[#allocation10 + $0x50] ss:$8 sps:$4 sm:$0xff]   ;;  %v4448_v20 = vld [vmem:[#allocation10 + $0x64] ss:$8 sps:$4 sm:$0xff]  }
 0x1ca   : > { %2329 = vmatpush1.bf16.msra.mxu0 %v4347_v21  ;;  %2415 = vmatpush1.bf16.msra.mxu1 %v4350_v22  ;;  %v4446_v21 = vld [vmem:[#allocation10 + $0x60] ss:$8 sps:$4 sm:$0xff]   ;;  %v4451_v22 = vld [vmem:[#allocation10 + $0x74] ss:$8 sps:$4 sm:$0xff]  }
 0x1cb   : > { %2330 = vmatprep.subr.bf16.mxu0 %v4355_v23  ;;  %2416 = vmatprep.subr.bf16.mxu1 %v4358_v24  ;;  %v4449_v23 = vld [vmem:[#allocation10 + $0x70] ss:$8 sps:$4 sm:$0xff]   ;;  %v4454_v24 = vld [vmem:[#allocation10 + $0x84] ss:$8 sps:$4 sm:$0xff]  }
 0x1ce   : > { %2331 = vmatpush1.bf16.msra.mxu0 %v4353_v25  ;;  %2417 = vmatpush1.bf16.msra.mxu1 %v4356_v26  ;;  %v4452_v25 = vld [vmem:[#allocation10 + $0x80] ss:$8 sps:$4 sm:$0xff]   ;;  %v4457_v26 = vld [vmem:[#allocation10 + $0x94] ss:$8 sps:$4 sm:$0xff]  }
 0x1cf   : > { %2332 = vmatprep.subr.bf16.mxu0 %v4361_v27  ;;  %2418 = vmatprep.subr.bf16.mxu1 %v4364_v28  ;;  %v4455_v27 = vld [vmem:[#allocation10 + $0x90] ss:$8 sps:$4 sm:$0xff]   ;;  %v4460_v28 = vld [vmem:[#allocation10 + $0xa4] ss:$8 sps:$4 sm:$0xff]  }
 0x1d2   : > { %2333 = vmatpush1.bf16.msra.mxu0 %v4359_v29  ;;  %2419 = vmatpush1.bf16.msra.mxu1 %v4362_v30  ;;  %v4458_v29 = vld [vmem:[#allocation10 + $0xa0] ss:$8 sps:$4 sm:$0xff]   ;;  %v4463_v30 = vld [vmem:[#allocation10 + $0xb4] ss:$8 sps:$4 sm:$0xff]  }
 0x1d3   : > { %2334 = vmatprep.subr.bf16.mxu0 %v4367_v31  ;;  %2420 = vmatprep.subr.bf16.mxu1 %v4370_v32  ;;  %v4461_v31 = vld [vmem:[#allocation10 + $0xb0] ss:$8 sps:$4 sm:$0xff]   ;;  %v4466_v32 = vld [vmem:[#allocation10 + $0xc4] ss:$8 sps:$4 sm:$0xff]  }
 0x1d6   : > { %2335 = vmatpush1.bf16.msra.mxu0 %v4365_v33  ;;  %2421 = vmatpush1.bf16.msra.mxu1 %v4368_v34  ;;  %v4464_v33 = vld [vmem:[#allocation10 + $0xc0] ss:$8 sps:$4 sm:$0xff]   ;;  %v4469_v34 = vld [vmem:[#allocation10 + $0xd4] ss:$8 sps:$4 sm:$0xff]  }
 0x1d7   : > { %2336 = vmatprep.subr.bf16.mxu0 %v4373_v35  ;;  %2422 = vmatprep.subr.bf16.mxu1 %v4376_v36  ;;  %v4467_v35 = vld [vmem:[#allocation10 + $0xd0] ss:$8 sps:$4 sm:$0xff]   ;;  %v2453_v36 = vlaneseq }
 0x1da   : > { %2337 = vmatpush1.bf16.msra.mxu0 %v4371_v37  ;;  %2423 = vmatpush1.bf16.msra.mxu1 %v4374_v38  ;;  %v5234_v37 = vshrl.u32 %v2453_v36, 7  ;;  %v4493_v36 = vld [vmem:[#allocation10 + $0x154] ss:$8 sps:$4 sm:$0xff]  }
 0x1db   : > { %2338 = vmatprep.subr.bf16.mxu0 %v4379_v39  ;;  %2424 = vmatprep.subr.bf16.mxu1 %v4382_v40  ;;  %v2451_v39 = vld [vmem:[%s5318_s4] sm:$0xf] }
 0x1dc   : > { %v2463_v38 = vsub.s32 2, %v5234_v37 }
 0x1de   : > { %2339 = vmatpush1.bf16.msra.mxu0 %v4377_v41  ;;  %2425 = vmatpush1.bf16.msra.mxu1 %v4380_v42  ;;  %v2464_v40 = vrot.slane %v2451_v39, %v2463_v38  ;;  %v4472_v41 = vld [vmem:[#allocation10 + $0xe4] ss:$8 sps:$4 sm:$0xff]   ;;  %v4470_v42 = vld [vmem:[#allocation10 + $0xe0] ss:$8 sps:$4 sm:$0xff]   ;;  %v4491_v38 = vld [vmem:[#allocation10 + $0x150] ss:$8 sps:$4 sm:$0xff]  }
 0x1df   : > { %2340 = vmatprep.subr.bf16.mxu0 %v4385_v43  ;;  %2426 = vmatprep.subr.bf16.mxu1 %v4388_v44  ;;  %v4475_v43 = vld [vmem:[#allocation10 + $0xf4] ss:$8 sps:$4 sm:$0xff]   ;;  %v4473_v44 = vld [vmem:[#allocation10 + $0xf0] ss:$8 sps:$4 sm:$0xff]  }
 0x1e2   : > { %2341 = vmatpush1.bf16.msra.mxu0 %v4383_v45  ;;  %2427 = vmatpush1.bf16.msra.mxu1 %v4386_v46  ;;  %v4478_v45 = vld [vmem:[#allocation10 + $0x104] ss:$8 sps:$4 sm:$0xff]  }
 0x1e3   : > { %2342 = vmatprep.subr.bf16.mxu0 %v4391_v47  ;;  %2428 = vmatprep.subr.bf16.mxu1 %v4394_v48  ;;  %v4524_v46 = vld [vmem:[#allocation11 + $0x40] sm:$0xff]   ;;  %v4526_v48 = vld [vmem:[#allocation11 + $0x48] sm:$0xff]  }
 0x1e4   : > { %v4525_v47 = vld [vmem:[#allocation11] sm:$0xff]  }
 0x1e6   : > { %2343 = vmatpush1.bf16.msra.mxu0 %v4389_v49  ;;  %2429 = vmatpush1.bf16.msra.mxu1 %v4392_v50  ;;  %v4527_v49 = vld [vmem:[#allocation11 + $0x8] sm:$0xff]   ;;  %v4528_v50 = vld [vmem:[#allocation11 + $0x50] sm:$0xff]  }
 0x1e7   : > { %2344 = vmatprep.subr.bf16.mxu0 %v4397_v51  ;;  %2430 = vmatprep.subr.bf16.mxu1 %v4400_v52  ;;  %v4529_v51 = vld [vmem:[#allocation11 + $0x10] sm:$0xff]   ;;  %v4530_v52 = vld [vmem:[#allocation11 + $0x58] sm:$0xff]  }
 0x1ea   : > { %2345 = vmatpush1.bf16.msra.mxu0 %v4395_v53  ;;  %2431 = vmatpush1.bf16.msra.mxu1 %v4398_v54  ;;  %v4531_v53 = vld [vmem:[#allocation11 + $0x18] sm:$0xff]   ;;  %v4532_v54 = vld [vmem:[#allocation11 + $0x60] sm:$0xff]  }
 0x1eb   : > { %2346 = vmatprep.subr.bf16.mxu0 %v4403_v55  ;;  %2432 = vmatprep.subr.bf16.mxu1 %v4406_v56  ;;  %v4533_v55 = vld [vmem:[#allocation11 + $0x20] sm:$0xff]   ;;  %v4534_v56 = vld [vmem:[#allocation11 + $0x68] sm:$0xff]  }
 0x1ee   : > { %2347 = vmatpush1.bf16.msra.mxu0 %v4401_v57  ;;  %2433 = vmatpush1.bf16.msra.mxu1 %v4404_v58  ;;  %v2455_v57 = vsub.s32 0, %v5234_v37  ;;  %v2459_v58 = vsub.s32 1, %v5234_v37 }
 0x1ef   : > { %2348 = vmatprep.subr.bf16.mxu0 %v4409_v59  ;;  %2434 = vmatprep.subr.bf16.mxu1 %v4412_v60  ;;  %v2467_v59 = vsub.s32 3, %v5234_v37  ;;  %v4541_v37 = vld [vmem:[#allocation13 + $0x8] sm:$0xff]  }
 0x1f0   : > { %v2456_v60 = vrot.slane %v2451_v39, %v2455_v57 }
 0x1f2   : > { %2349 = vmatpush1.bf16.msra.mxu0 %v4407_v61  ;;  %2435 = vmatpush1.bf16.msra.mxu1 %v4410_v62  ;;  %v2460_v61 = vrot.slane %v2451_v39, %v2459_v58  ;;  %v2468_v62 = vrot.slane %v2451_v39, %v2467_v59  ;;  %v4496_v39 = vld [vmem:[#allocation10 + $0x164] ss:$8 sps:$4 sm:$0xff]   ;;  %v4523_v59 = vld [vmem:[#allocation10 + $0x1f4] ss:$8 sps:$4 sm:$0xff]  }
 0x1f3   : > { %2350 = vmatprep.subr.bf16.mxu0 %v4415_v63  ;;  %2436 = vmatprep.subr.bf16.mxu1 %v4418_v0 }
 0x1f6   : > { %2351 = vmatpush1.bf16.msra.mxu0 %v4413_v1  ;;  %2437 = vmatpush1.bf16.msra.mxu1 %v4416_v2 }
 0x1f7   : > { %2352 = vmatprep.subr.bf16.mxu0 %v4421_v3  ;;  %2438 = vmatprep.subr.bf16.mxu1 %v4424_v4 }
 0x1fa   : > { %2353 = vmatpush1.bf16.msra.mxu0 %v4419_v5  ;;  %2439 = vmatpush1.bf16.msra.mxu1 %v4422_v6 }
 0x1fb   : > { %2889 = vmatprep.subr.bf16.mxu0 %v4430_v7  ;;  %3837 = vmatprep.subr.bf16.mxu1 %v4524_v46  ;;  %v4503_v46 = vld [vmem:[#allocation10 + $0x190] ss:$8 sps:$4 sm:$0xff]  }
 0x1fd   : > { %2355 = vmatmul.mubr.bf16.vlgmr.msra.gmra.mrb[0].mxu0 %v4425_v8  ;;  %2441 = vmatmul.mubr.bf16.vlgmr.msra.gmra.mrb[0].mxu1 %v4425_v8 }
 0x1fe   : > { %2890 = vmatpush1.bf16.msra.mxu0 %v4428_v9  ;;  %3838 = vmatpush3.bf16.msra.mxu1 %v4525_v47  ;;  %v4508_v47 = vld [vmem:[#allocation10 + $0x1a4] ss:$8 sps:$4 sm:$0xff]  }
 0x1ff   : > { %2891 = vmatprep.subr.bf16.mxu0 %v4433_v10  ;;  %3839 = vmatprep.subr.bf16.mxu1 %v4526_v48  ;;  %v4506_v48 = vld [vmem:[#allocation10 + $0x1a0] ss:$8 sps:$4 sm:$0xff]  }
 0x202   : > { %2892 = vmatpush1.bf16.msra.mxu0 %v4431_v11  ;;  %3840 = vmatpush3.bf16.msra.mxu1 %v4527_v49  ;;  %v4511_v49 = vld [vmem:[#allocation10 + $0x1b4] ss:$8 sps:$4 sm:$0xff]  }
 0x203   : > { %2893 = vmatprep.subr.bf16.mxu0 %v4436_v12  ;;  %3841 = vmatprep.subr.bf16.mxu1 %v4528_v50  ;;  %v4509_v50 = vld [vmem:[#allocation10 + $0x1b0] ss:$8 sps:$4 sm:$0xff]  }
 0x206   : > { %2894 = vmatpush1.bf16.msra.mxu0 %v4434_v13  ;;  %3842 = vmatpush3.bf16.msra.mxu1 %v4529_v51  ;;  %v4514_v51 = vld [vmem:[#allocation10 + $0x1c4] ss:$8 sps:$4 sm:$0xff]  }
 0x207   : > { %2895 = vmatprep.subr.bf16.mxu0 %v4439_v14  ;;  %3843 = vmatprep.subr.bf16.mxu1 %v4530_v52  ;;  %v4512_v52 = vld [vmem:[#allocation10 + $0x1c0] ss:$8 sps:$4 sm:$0xff]  }
 0x20a   : > { %2896 = vmatpush1.bf16.msra.mxu0 %v4437_v15  ;;  %3844 = vmatpush3.bf16.msra.mxu1 %v4531_v53  ;;  %v4517_v53 = vld [vmem:[#allocation10 + $0x1d4] ss:$8 sps:$4 sm:$0xff]  }
 0x20b   : > { %2897 = vmatprep.subr.bf16.mxu0 %v4442_v16  ;;  %3845 = vmatprep.subr.bf16.mxu1 %v4532_v54  ;;  %v4515_v54 = vld [vmem:[#allocation10 + $0x1d0] ss:$8 sps:$4 sm:$0xff]  }
 0x20e   : > { %2898 = vmatpush1.bf16.msra.mxu0 %v4440_v17  ;;  %3846 = vmatpush3.bf16.msra.mxu1 %v4533_v55  ;;  %v4520_v55 = vld [vmem:[#allocation10 + $0x1e4] ss:$8 sps:$4 sm:$0xff]  }
 0x20f   : > { %2899 = vmatprep.subr.bf16.mxu0 %v4445_v18  ;;  %3847 = vmatprep.subr.bf16.mxu1 %v4534_v56  ;;  %v4518_v56 = vld [vmem:[#allocation10 + $0x1e0] ss:$8 sps:$4 sm:$0xff]  }
 0x212   : > { %2900 = vmatpush1.bf16.msra.mxu0 %v4443_v19 }
 0x213   : > { %2901 = vmatprep.subr.bf16.mxu0 %v4448_v20 }
 0x216   : > { %2902 = vmatpush1.bf16.msra.mxu0 %v4446_v21 }
 0x217   : > { %2903 = vmatprep.subr.bf16.mxu0 %v4451_v22 }
 0x21a   : > { %2904 = vmatpush1.bf16.msra.mxu0 %v4449_v23 }
 0x21b   : > { %2905 = vmatprep.subr.bf16.mxu0 %v4454_v24 }
 0x21e   : > { %2906 = vmatpush1.bf16.msra.mxu0 %v4452_v25 }
 0x21f   : > { %2907 = vmatprep.subr.bf16.mxu0 %v4457_v26 }
 0x222   : > { %2908 = vmatpush1.bf16.msra.mxu0 %v4455_v27  ;;  %v4476_v27 = vld [vmem:[#allocation10 + $0x100] ss:$8 sps:$4 sm:$0xff]  }
 0x223   : > { %2909 = vmatprep.subr.bf16.mxu0 %v4460_v28  ;;  %v4481_v28 = vld [vmem:[#allocation10 + $0x114] ss:$8 sps:$4 sm:$0xff]  }
 0x226   : > { %2910 = vmatpush1.bf16.msra.mxu0 %v4458_v29  ;;  %v4479_v29 = vld [vmem:[#allocation10 + $0x110] ss:$8 sps:$4 sm:$0xff]  }
 0x227   : > { %2911 = vmatprep.subr.bf16.mxu0 %v4463_v30  ;;  %v4484_v30 = vld [vmem:[#allocation10 + $0x124] ss:$8 sps:$4 sm:$0xff]  }
 0x22a   : > { %2912 = vmatpush1.bf16.msra.mxu0 %v4461_v31  ;;  %v4482_v31 = vld [vmem:[#allocation10 + $0x120] ss:$8 sps:$4 sm:$0xff]  }
 0x22b   : > { %2913 = vmatprep.subr.bf16.mxu0 %v4466_v32  ;;  %v4487_v32 = vld [vmem:[#allocation10 + $0x134] ss:$8 sps:$4 sm:$0xff]  }
 0x22e   : > { %2914 = vmatpush1.bf16.msra.mxu0 %v4464_v33  ;;  %v4485_v33 = vld [vmem:[#allocation10 + $0x130] ss:$8 sps:$4 sm:$0xff]  }
 0x22f   : > { %2915 = vmatprep.subr.bf16.mxu0 %v4469_v34  ;;  %v4490_v34 = vld [vmem:[#allocation10 + $0x144] ss:$8 sps:$4 sm:$0xff]  }
 0x232   : > { %2916 = vmatpush1.bf16.msra.mxu0 %v4467_v35  ;;  %v4488_v35 = vld [vmem:[#allocation10 + $0x140] ss:$8 sps:$4 sm:$0xff]  }
 0x233   : > { %2917 = vmatprep.subr.bf16.mxu0 %v4472_v41  ;;  %v4499_v41 = vld [vmem:[#allocation10 + $0x174] ss:$8 sps:$4 sm:$0xff]  }
 0x236   : > { %2918 = vmatpush1.bf16.msra.mxu0 %v4470_v42  ;;  %v4497_v42 = vld [vmem:[#allocation10 + $0x170] ss:$8 sps:$4 sm:$0xff]  }
 0x237   : > { %2919 = vmatprep.subr.bf16.mxu0 %v4475_v43  ;;  %v4502_v43 = vld [vmem:[#allocation10 + $0x184] ss:$8 sps:$4 sm:$0xff]  }
 0x23a   : > { %2920 = vmatpush1.bf16.msra.mxu0 %v4473_v44  ;;  %v4500_v44 = vld [vmem:[#allocation10 + $0x180] ss:$8 sps:$4 sm:$0xff]  }
 0x23b   : > { %2932 = vmatprep.subr.bf16.mxu0 %v4478_v45  ;;  %v4505_v45 = vld [vmem:[#allocation10 + $0x194] ss:$8 sps:$4 sm:$0xff]  }
 0x2d0   : > { %v2356_v63 = vpop.f32.mrb[0].mxu0  ;;  %v2442_v0 = vpop.f32.mrb[0].mxu1 }
 0x2d1   : > { %v2473_v1 = vadd.f32 %v2456_v60, %v2356_v63  ;;  %v2475_v2 = vadd.f32 %v2464_v40, %v2442_v0  ;;  %v2358_v3 = vpop.f32.mrb[1].mxu0  ;;  %v2444_v4 = vpop.f32.mrb[1].mxu1  ;;  %v4537_v63 = vld [vmem:[#allocation11 + $0x30] sm:$0xff]   ;;  %v4538_v0 = vld [vmem:[#allocation11 + $0x78] sm:$0xff]  }
 0x2d2   : > { %v2474_v5 = vadd.f32 %v2460_v61, %v2358_v3  ;;  %v2476_v6 = vadd.f32 %v2468_v62, %v2444_v4  ;;  %v2360_v7 = vpop.f32.mrb[2].mxu0  ;;  %v2446_v8 = vpop.f32.mrb[2].mxu1  ;;  %v2557_v3 = vld [vmem:[%s5320_s6] sm:$0x3] }
 0x2d3   : > { %v2477_v9 = vadd.f32 %v2456_v60, %v2360_v7  ;;  %v2479_v10 = vadd.f32 %v2464_v40, %v2446_v8  ;;  %v2362_v11 = vpop.f32.mrb[3].mxu0  ;;  %v2448_v12 = vpop.f32.mrb[3].mxu1  ;;  %v2481_v15 = vmax.f32 %v2473_v1, 0.0  ;;  %v2483_v16 = vmax.f32 %v2475_v2, 0.0  ;;  %v4494_v40 = vld [vmem:[#allocation10 + $0x160] ss:$8 sps:$4 sm:$0xff]  }
 0x2d4   : > { %v2478_v13 = vadd.f32 %v2460_v61, %v2362_v11  ;;  %v2480_v14 = vadd.f32 %v2468_v62, %v2448_v12  ;;  %v2482_v19 = vmax.f32 %v2474_v5, 0.0  ;;  %v2484_v20 = vmax.f32 %v2476_v6, 0.0  ;;  %v4521_v60 = vld [vmem:[#allocation10 + $0x1f0] ss:$8 sps:$4 sm:$0xff]   ;;  %v4535_v61 = vld [vmem:[#allocation11 + $0x28] sm:$0xff]  }
 0x2d5   : > { %v2485_v17 = vmax.f32 %v2477_v9, 0.0  ;;  %v2487_v18 = vmax.f32 %v2479_v10, 0.0  ;;  %3848 = vmatpush3.bf16.msra.mxu1 %v4535_v61  ;;  %v4536_v62 = vld [vmem:[#allocation11 + $0x70] sm:$0xff]   ;;  %v4539_v1 = vld [vmem:[#allocation11 + $0x38] sm:$0xff]   ;;  %v4845_v2 = vmov 0.0   ;;  %v2562_v4 = vrot.slane %v2557_v3, %v2455_v57 }
 0x2d6   : > { %v2486_v21 = vmax.f32 %v2478_v13, 0.0  ;;  %v2488_v22 = vmax.f32 %v2480_v14, 0.0  ;;  %3849 = vmatprep.subr.bf16.mxu1 %v4536_v62  ;;  %v2566_v5 = vrot.slane %v2557_v3, %v2459_v58  ;;  %v4542_v57 = vld [vmem:[#allocation13 + $0x10] sm:$0xff]   ;;  %v4543_v58 = vld [vmem:[#allocation13 + $0x18] sm:$0xff]  }
 0x2d7   : > { %v2489_v23 = vpack.c.bf16 %v2485_v17, %v2481_v15  ;;  %v5247_v24 = vpack.c.bf16 %v2487_v18, %v2483_v16 }
 0x2d8   : > { %v2490_v25 = vpack.c.bf16 %v2486_v21, %v2482_v19  ;;  %v2492_v26 = vpack.c.bf16 %v2488_v22, %v2484_v20  ;;  %v4540_v20 = vld [vmem:[#allocation13] sm:$0xff]   ;;  %v4545_v22 = vld [vmem:[#allocation13 + $0x28] sm:$0xff]  }
 0x2d9   : > { %3850 = vmatpush3.bf16.msra.mxu1 %v4537_v63  ;;  %v4544_v21 = vld [vmem:[#allocation13 + $0x20] sm:$0xff]  }
 0x2da   : > { %2921 = vmatprep.mubr.bf16.mxu0 %v2490_v25  ;;  %3851 = vmatprep.subr.bf16.mxu1 %v4538_v0 }
 0x2db   : > { %2922 = vmatmul.mubr.bf16.vlgmr.msra.gmra.mrb[4].mxu0 %v2489_v23  ;;  %v4546_v23 = vld [vmem:[#allocation13 + $0x30] sm:$0xff]  }
 0x2dc   : > { %2933 = vmatpush1.bf16.msra.mxu0 %v4476_v27  ;;  %2964 = vmatprep.mubr.bf16.mxu0 %v2492_v26  ;;  %v3792_v26 = vld [vmem:[%s5371_s3] ss:$0 sm:$0xff] }
 0x2dd   : > { %2934 = vmatprep.subr.bf16.mxu0 %v4481_v28  ;;  %3852 = vmatpush3.bf16.msra.mxu1 %v4539_v1 }
 0x2de   : > { %3868 = vmatprep.subr.bf16.mxu1 %v4845_v2 }
 0x2e0   : > { %2935 = vmatpush1.bf16.msra.mxu0 %v4479_v29 }
 0x2e1   : > { %2936 = vmatprep.subr.bf16.mxu0 %v4484_v30 }
 0x2e4   : > { %2937 = vmatpush1.bf16.msra.mxu0 %v4482_v31 }
 0x2e5   : > { %2938 = vmatprep.subr.bf16.mxu0 %v4487_v32 }
 0x2e8   : > { %2939 = vmatpush1.bf16.msra.mxu0 %v4485_v33 }
 0x2e9   : > { %2940 = vmatprep.subr.bf16.mxu0 %v4490_v34 }
 0x2ec   : > { %2941 = vmatpush1.bf16.msra.mxu0 %v4488_v35 }
 0x2ed   : > { %2942 = vmatprep.subr.bf16.mxu0 %v4493_v36 }
 0x2f0   : > { %2943 = vmatpush1.bf16.msra.mxu0 %v4491_v38  ;;  %v3809_v38 = vld [vmem:[%s5372_s11] ss:$0 sm:$0xff] }
 0x2f1   : > { %2944 = vmatprep.subr.bf16.mxu0 %v4496_v39 }
 0x2f4   : > { %2945 = vmatpush1.bf16.msra.mxu0 %v4494_v40 }
 0x2f5   : > { %2946 = vmatprep.subr.bf16.mxu0 %v4499_v41 }
 0x2f8   : > { %2947 = vmatpush1.bf16.msra.mxu0 %v4497_v42 }
 0x2f9   : > { %2948 = vmatprep.subr.bf16.mxu0 %v4502_v43 }
 0x2fc   : > { %2949 = vmatpush1.bf16.msra.mxu0 %v4500_v44 }
 0x2fd   : > { %2950 = vmatprep.subr.bf16.mxu0 %v4505_v45 }
 0x300   : > { %2951 = vmatpush1.bf16.msra.mxu0 %v4503_v46 }
 0x301   : > { %2952 = vmatprep.subr.bf16.mxu0 %v4508_v47 }
 0x304   : > { %2953 = vmatpush1.bf16.msra.mxu0 %v4506_v48 }
 0x305   : > { %2954 = vmatprep.subr.bf16.mxu0 %v4511_v49 }
 0x308   : > { %2955 = vmatpush1.bf16.msra.mxu0 %v4509_v50 }
 0x309   : > { %2956 = vmatprep.subr.bf16.mxu0 %v4514_v51 }
 0x30c   : > { %2957 = vmatpush1.bf16.msra.mxu0 %v4512_v52 }
 0x30d   : > { %2958 = vmatprep.subr.bf16.mxu0 %v4517_v53 }
 0x310   : > { %2959 = vmatpush1.bf16.msra.mxu0 %v4515_v54 }
 0x311   : > { %2960 = vmatprep.subr.bf16.mxu0 %v4520_v55 }
 0x314   : > { %2961 = vmatpush1.bf16.msra.mxu0 %v4518_v56 }
 0x315   : > { %2962 = vmatprep.subr.bf16.mxu0 %v4523_v59 }
 0x318   : > { %2963 = vmatpush1.bf16.msra.mxu0 %v4521_v60 }
 0x31b   : > { %2965 = vmatmul.mubr.bf16.vlgmr.msra.gmra.mrb[4].mxu0 %v5247_v24  ;;  %v4547_v24 = vld [vmem:[#allocation13 + $0x38] sm:$0xff]  }
 0x3ee   : > { %v2966_v6 = vpop.f32.mrb[4].mxu0 }
 0x3ef   : > { %v3888_v7 = vadd.f32 %v2966_v6, %v2562_v4  ;;  %v2968_v8 = vpop.f32.mrb[5].mxu0 }
 0x3f0   : > { %v3889_v9 = vadd.f32 %v2968_v8, %v2566_v5  ;;  %v2970_v10 = vpop.f32.mrb[6].mxu0 }
 0x3f1   : > { %v3890_v11 = vadd.f32 %v2970_v10, %v2562_v4  ;;  %v2972_v12 = vpop.f32.mrb[7].mxu0  ;;  %v2975_v14 = vmax.f32 %v3888_v7, 0.0 }
 0x3f2   : > { %v3891_v13 = vadd.f32 %v2972_v12, %v2566_v5  ;;  %v2976_v16 = vmax.f32 %v3889_v9, 0.0 }
 0x3f3   : > { %v2977_v15 = vmax.f32 %v3890_v11, 0.0 }
 0x3f4   : > { %v2978_v17 = vmax.f32 %v3891_v13, 0.0 }
 0x3f5   : > { %v2979_v18 = vpack.c.bf16 %v2977_v15, %v2975_v14 }
 0x3f6   : > { %v2980_v19 = vpack.c.bf16 %v2978_v17, %v2976_v16 }
 0x3f8   : > { %3148 = vmatprep.mubr.bf16.mxu1 %v2980_v19 }
 0x3f9   : > { %3149 = vmatmul.mubr.bf16.vlgmr.msra.gmra.mrb[4].mxu1 %v2979_v18 }
 0x3fa   : > { %3869 = vmatpush3.bf16.msra.mxu1 %v4540_v20  ;;  %3884 = vmatprep.mubr.msk.bf16.mxu1 %vm4846_vm0, %v4845_v2 }
 0x3fb   : > { %3870 = vmatprep.subr.bf16.mxu1 %v4845_v2 }
 0x3fe   : > { %3871 = vmatpush3.bf16.msra.mxu1 %v4541_v37 }
 0x3ff   : > { %3872 = vmatprep.subr.bf16.mxu1 %v4845_v2 }
 0x402   : > { %3873 = vmatpush3.bf16.msra.mxu1 %v4542_v57 }
 0x403   : > { %3874 = vmatprep.subr.bf16.mxu1 %v4845_v2 }
 0x406   : > { %3875 = vmatpush3.bf16.msra.mxu1 %v4543_v58 }
 0x407   : > { %3876 = vmatprep.subr.bf16.mxu1 %v4845_v2 }
 0x40a   : > { %3877 = vmatpush3.bf16.msra.mxu1 %v4544_v21 }
 0x40b   : > { %3878 = vmatprep.subr.bf16.mxu1 %v4845_v2 }
 0x40e   : > { %3879 = vmatpush3.bf16.msra.mxu1 %v4545_v22 }
 0x40f   : > { %3880 = vmatprep.subr.bf16.mxu1 %v4845_v2 }
 0x412   : > { %3881 = vmatpush3.bf16.msra.mxu1 %v4546_v23 }
 0x413   : > { %3882 = vmatprep.subr.bf16.mxu1 %v4845_v2 }
 0x416   : > { %3883 = vmatpush3.bf16.msra.mxu1 %v4547_v24 }
 0x4cc   : > { %v3853_v25 = vpop.f32.mrb[4].mxu1 }
 0x4cd   : > { %v3854_v27 = vpop.f32.mrb[5].mxu1 }
 0x4ce   : > { %v3855_v28 = vadd.f32 %v3854_v27, %v3853_v25  ;;  %v3856_v29 = vpop.f32.mrb[6].mxu1 }
 0x4cf   : > { %v3857_v30 = vpop.f32.mrb[7].mxu1 }
 0x4d0   : > { %v3151_v31 = vadd.f32 %v3855_v28, %v3792_v26  ;;  %v3858_v32 = vadd.f32 %v3857_v30, %v3856_v29 }
 0x4d2   : > { %v3154_v33 = vadd.f32 %v3858_v32, %v3792_v26  ;;  %v3157_v34 = vmax.f32 %v3151_v31, 0.0 }
 0x4d4   : > { %v3158_v35 = vmax.f32 %v3154_v33, 0.0 }
 0x4d6   : > { %v3159_v36 = vpack.c.bf16 %v3158_v35, %v3157_v34 }
 0x4d8   : > { %3885 = vmatmul.mubr.bf16.vlgmr.msra.gmra.mrb[8].mxu1 %v3159_v36 }
 0x5ab   : > { %v3265_v39 = vpop.f32.mrb[8].mxu1 }
 0x5ac   : > { %v3886_v40 = vpop.f32.mrb[9].mxu1  ;;  %v3266_v42 = vadd.f32 %v3809_v38, %v3265_v39 }
 0x5ad   : > { %v3268_v41 = vpop.f32.mrb[10].mxu1 }
 0x5ae   : > { %v3269_v43 = vadd.f32 %v3809_v38, %v3268_v41  ;;  %v3887_v44 = vpop.f32.mrb[11].mxu1 }
 0x5b0   : > { %v3835_v45 = vpack.c.bf16 %v3269_v43, %v3266_v42 }
 0x5b2   : > { %3836 = vst [vmem:[%s518_s8] sm:$0xff] %v3835_v45  }
 0x5b3   : > { %4761 = shalt.err (!%p4758_p8)
}
 0x5b4   : > { %s4762_s30 = scalar_lea.hbm %s5270_s24, 128  ;;  %s4766_s3 = scalar_lea.hbm %s5373_s27, 256 }
 0x5b5   : > { %p4763_p11 = scmp.ne.s32.totalorder %s5270_s24, %s4762_s30  ;;  %p4767_p1 = scmp.lt.u32.totalorder %s5270_s24, %s5373_s27 }
 0x5b6   : > { %p4768_p13 = scmp.lt.u32.totalorder %s4766_s3, %s4762_s30  ;;  %p4770_p7 = scmp.lt.u32.totalorder %s4762_s30, %s5270_s24 }
 0x5b7   : > { %p4764_p3 = pnand %p4763_p11, %p5374_p2 }
 0x5b8   : > { %p4769_p0 = por %p4768_p13, %p4767_p1 }
 0x5b9   : > { %p4765_p12 = pneg %p4764_p3 }
 0x5ba   : > { %p4771_p6 = por %p4770_p7, %p4769_p0 }
 0x5bc   : > { %p4772_p10 = pnand %p4771_p6, %p4765_p12 }
 0x5be   : > { %4775 = shalt.err (!%p4772_p10)
}
 0x5bf   : > { %s4848_s26 = smov 64   ;;  %s4849_s11 = smov 4  }
 0x5c0   : > { %3944 = dma.vmem_to_hbm [thread:$0]  (%p5374_p2), %s5265_s0, 128, %s5270_s24, %s3283_s14, %s4848_s26, %s4848_s26, %s4849_s11  }
 0x5c1 PF: > { %s3311_s8 = sand.u32 1, %s4818_s17   ;;  %p5375_p5 = scmp.ne.s32.totalorder %s5359_s28, 0 }
 0x5c2   : > { %p5376_p9 = scmp.ge.s32.totalorder %s4830_s20, 2  ;;  %s3312_s10 = scalar_lea.sflag [#allocation4], %s3311_s8 }
 0x5c4   : > { %p3970_p4 = pnand %p5376_p9, %p5375_p5 }
 0x5c6   : > { %4813 = dma.done.wait (!%p3970_p4), %s3312_s10, 128  }
 0x5c7   : > { %4815 = vsyncadd (!%p3970_p4), %s3312_s10, 4294967168  ;;  %s5377_s9 = sld [smem:[#allocation21_spill]]  ;;  %p29_p8 = scmp.ge.s32.totalorder %s5080_s16, 4  }
 0x5c8   : > { %s5378_s17 = smov %s4822_s18  ;;  %s5379_s18 = smov %s4826_s19 }
 0x5c9   : > { %s5381_s20 = smov %s5080_s16  ;;  %31 = sbr.rel (!%p29_p8) target bundleno = 19 (0x13), region = 142 }
 0x5cd   : > { %s5380_s19 = smov %s5377_s9 }
 0x5d0   :  { %3317 = vsyncpa [#allocation3], 1 }
 0x5d1   :  { %3319 = vsyncpa [#allocation3 + $0x1], 1 }
 0x5d2   :  { %3320 = vsyncpa [#allocation6], 1 }
 0x5d3   :  { %3322 = vsyncpa [#allocation6 + $0x1], 1 }
 0x5d4   :  { %3323 = vsyncpa [#allocation9], 1 }
 0x5d5   :  { %3324 = vsyncpa [#allocation12], 1 }
 0x5d6   :  { %3325 = vsyncpa [#allocation4], 1 }
 0x5d7   :  { %3327 = vsyncpa [#allocation4 + $0x1], 1 }

</bundles_post_ra>
